<compile_context>
chip_gen: v5e
topology: v5e:2x2
jax: 0.10.0
libtpu: 0.0.40
codegen_flags: <defaults>
</compile_context>

<pallas_src>
import functools
import math

import jax
import jax.numpy as jnp
from jax.experimental import pallas as pl
from jax.experimental.pallas import tpu as pltpu


def _ceil_to(x, m):
    return ((x + m - 1) // m) * m


# ----------------------------------------------------------------------------
# Fused tiled matmul kernel:  o = act(LN(x) @ w + b) [+ residual]
# ----------------------------------------------------------------------------

def _fused_matmul_kernel(*refs, activation, has_ln, has_residual, k_real, eps):
    it = iter(refs)
    x_ref = next(it)
    w_ref = next(it)
    b_ref = next(it)
    g_ref = next(it) if has_ln else None
    bb_ref = next(it) if has_ln else None
    r_ref = next(it) if has_residual else None
    o_ref = next(it)
    acc_ref = next(it)

    k = pl.program_id(2)

    @pl.when(k == 0)
    def _():
        acc_ref[...] = jnp.zeros_like(acc_ref)

    x = x_ref[...]
    if has_ln:
        # LayerNorm prologue (requires the full K extent in this block).
        # Uses sum / sum-of-squares so zero-padded K columns stay harmless.
        xf = x.astype(jnp.float32)
        s1 = jnp.sum(xf, axis=-1, keepdims=True)
        s2 = jnp.sum(xf * xf, axis=-1, keepdims=True)
        mean = s1 * (1.0 / k_real)
        var = s2 * (1.0 / k_real) - mean * mean
        xn = (xf - mean) * jax.lax.rsqrt(var + eps)
        x = xn * g_ref[...].astype(jnp.float32) + bb_ref[...].astype(jnp.float32)

    x = x.astype(jnp.bfloat16)
    w = w_ref[...].astype(jnp.bfloat16)
    acc_ref[...] += jnp.dot(x, w, preferred_element_type=jnp.float32)

    @pl.when(k == pl.num_programs(2) - 1)
    def _():
        acc = acc_ref[...] + b_ref[...].astype(jnp.float32)
        if activation == "gelu":
            acc = jax.nn.gelu(acc)
        if has_residual:
            acc = acc + r_ref[...].astype(jnp.float32)
        o_ref[...] = acc.astype(o_ref.dtype)


def fused_linear(x, w, b, *, activation="none", residual=None,
                 ln_gamma=None, ln_beta=None, eps=1e-5, out_dtype=None,
                 tm=512, tn=512, tk=512):
    """Tiled dense layer on the last axis with optional fused LN / GELU /
    residual.  x: [..., K], w: [K, N], b: [N]."""
    lead = x.shape[:-1]
    K = x.shape[-1]
    N = w.shape[-1]
    x2 = x.reshape(-1, K)
    M = x2.shape[0]
    if out_dtype is None:
        out_dtype = x.dtype

    has_ln = ln_gamma is not None
    has_res = residual is not None

    # Keep the whole contraction in one block when an LN prologue (needs the
    # full row) or a fused residual epilogue (avoid re-reading the residual
    # tile per K step) is requested.  For ViT, K <= 4*embed, so this fits.
    if (has_ln or has_res) and K <= 4096:
        tk = _ceil_to(K, 128)

    tm = min(tm, _ceil_to(M, 8))
    tn = min(tn, _ceil_to(N, 128))
    tk = min(tk, _ceil_to(K, 128))
    Mp, Kp, Np = _ceil_to(M, tm), _ceil_to(K, tk), _ceil_to(N, tn)

    x_dtype = x2.dtype if has_ln else jnp.bfloat16
    xp = jnp.pad(x2, ((0, Mp - M), (0, Kp - K))).astype(x_dtype)
    wp = jnp.pad(w, ((0, Kp - K), (0, Np - N))).astype(jnp.bfloat16)
    bp = jnp.pad(b, (0, Np - N)).astype(jnp.float32).reshape(1, Np)

    in_specs = [
        pl.BlockSpec((tm, tk), lambda i, j, k: (i, k)),
        pl.BlockSpec((tk, tn), lambda i, j, k: (k, j)),
        pl.BlockSpec((1, tn), lambda i, j, k: (0, j)),
    ]
    args = [xp, wp, bp]
    if has_ln:
        gp = jnp.pad(ln_gamma, (0, Kp - K)).astype(jnp.float32).reshape(1, Kp)
        bbp = jnp.pad(ln_beta, (0, Kp - K)).astype(jnp.float32).reshape(1, Kp)
        in_specs += [pl.BlockSpec((1, Kp), lambda i, j, k: (0, 0)),
                     pl.BlockSpec((1, Kp), lambda i, j, k: (0, 0))]
        args += [gp, bbp]
    if has_res:
        r2 = residual.reshape(-1, N)
        rp = jnp.pad(r2, ((0, Mp - M), (0, Np - N))).astype(jnp.float32)
        in_specs.append(pl.BlockSpec((tm, tn), lambda i, j, k: (i, j)))
        args.append(rp)

    out = pl.pallas_call(
        functools.partial(_fused_matmul_kernel, activation=activation,
                          has_ln=has_ln, has_residual=has_res,
                          k_real=K, eps=eps),
        out_shape=jax.ShapeDtypeStruct((Mp, Np), out_dtype),
        grid=(Mp // tm, Np // tn, Kp // tk),
        in_specs=in_specs,
        out_specs=pl.BlockSpec((tm, tn), lambda i, j, k: (i, j)),
        scratch_shapes=[pltpu.VMEM((tm, tn), jnp.float32)],
        compiler_params=pltpu.CompilerParams(
            dimension_semantics=("parallel", "parallel", "arbitrary"),
            vmem_limit_bytes=48 * 1024 * 1024),
    )(*args)
    return out[:M, :N].reshape(*lead, N)


# ----------------------------------------------------------------------------
# Multi-head attention on the packed QKV tensor (no HBM head transposes)
# ----------------------------------------------------------------------------

def _attention_kernel(qkv_ref, o_ref, *, num_heads, d_model, n_real):
    x = qkv_ref[0]                                  # [Npad, 3*D], bf16
    n_pad = x.shape[0]
    dh = d_model // num_heads
    # Padded key positions (token padding) are masked out of the softmax.
    key_valid = jax.lax.broadcasted_iota(jnp.int32, (n_pad, n_pad), 1) < n_real
    outs = []
    for h in range(num_heads):
        lo = h * dh
        qh = x[:, lo:lo + dh]
        kh = x[:, d_model + lo:d_model + lo + dh]
        vh = x[:, 2 * d_model + lo:2 * d_model + lo + dh]
        # QK^T contracting the last axes directly (no explicit transpose);
        # the 1/sqrt(dh) scale is folded into the Q weights at init time.
        s = jax.lax.dot_general(qh, kh, (((1,), (1,)), ((), ())),
                                preferred_element_type=jnp.float32)
        s = jnp.where(key_valid, s, -1e30)
        s = s - jnp.max(s, axis=-1, keepdims=True)
        p = jnp.exp(s)
        p = p * pl.reciprocal(jnp.sum(p, axis=-1, keepdims=True), approx=True)
        outs.append(jnp.dot(p.astype(vh.dtype), vh,
                            preferred_element_type=jnp.float32))
    # Single lane-dense store of the merged heads.
    o_ref[0] = jnp.concatenate(outs, axis=-1).astype(o_ref.dtype)


def attention(qkv, *, num_heads, n_real):
    """qkv: [B, Npad, 3*D] (packed Q|K|V) -> [B, Npad, D]."""
    B, n_pad, d3 = qkv.shape
    d_model = d3 // 3
    return pl.pallas_call(
        functools.partial(_attention_kernel, num_heads=num_heads,
                          d_model=d_model, n_real=n_real),
        out_shape=jax.ShapeDtypeStruct((B, n_pad, d_model), qkv.dtype),
        grid=(B,),
        in_specs=[pl.BlockSpec((1, n_pad, d3), lambda b: (b, 0, 0))],
        out_specs=pl.BlockSpec((1, n_pad, d_model), lambda b: (b, 0, 0)),
        compiler_params=pltpu.CompilerParams(
            dimension_semantics=("parallel",),
            vmem_limit_bytes=48 * 1024 * 1024),
    )(qkv)


# ----------------------------------------------------------------------------
# ViT forward (glue in plain JAX, hot paths in the Pallas kernels above)
# ----------------------------------------------------------------------------

def extract_patches(images, patch):
    """NCHW images -> [B, N_patches, C*p*p], patch vector ordered (c, i, j)."""
    B, C, H, W = images.shape
    x = images.reshape(B, C, H // patch, patch, W // patch, patch)
    x = x.transpose(0, 2, 4, 1, 3, 5)               # B, H/p, W/p, C, p, p
    return x.reshape(B, (H // patch) * (W // patch), C * patch * patch)


def vit_forward(params, images, *, patch, num_heads, num_layers):
    assert images.ndim == 4, "The input is not a batch"
    B = images.shape[0]

    # --- VitEmbedding: conv(kernel=p, stride=p) as a patch matmul ------------
    patches = extract_patches(images, patch)                      # [B, Np, C*p*p]
    tok = fused_linear(patches, params["patch_w"], params["patch_b"],
                       out_dtype=jnp.float32)                     # [B, Np, D]
    D = tok.shape[-1]
    cls = jnp.broadcast_to(params["cls_token"].astype(jnp.float32), (B, 1, D))
    tok = jnp.concatenate([cls, tok], axis=1)                     # [B, Nr, D]
    n_real = tok.shape[1]
    tok = tok + params["pos_embed"][None, :n_real, :]
    # Pad the token axis to a sublane-friendly multiple of 8; padded rows are
    # carried through row-wise ops and masked out as attention keys.
    n_pad = _ceil_to(n_real, 8)
    tok = jnp.pad(tok, ((0, 0), (0, n_pad - n_real), (0, 0)))

    # --- Encoder: num_layers pre-norm transformer blocks ---------------------
    x = tok                                                        # f32 residual
    for layer in range(num_layers):
        p = params["layers"][layer]
        # LN1 + fused QKV projection (single [D, 3D] matmul), bf16 output.
        qkv = fused_linear(x, p["w_qkv"], p["b_qkv"],
                           ln_gamma=p["ln1_g"], ln_beta=p["ln1_b"],
                           out_dtype=jnp.bfloat16)
        attn = attention(qkv, num_heads=num_heads, n_real=n_real)
        # Output projection with the residual add fused into the epilogue.
        x = fused_linear(attn, p["wo"], p["bo"], residual=x,
                         out_dtype=jnp.float32)
        # LN2 + FF1 + GELU fused; FF2 + residual fused.
        h = fused_linear(x, p["w_ff1"], p["b_ff1"], activation="gelu",
                         ln_gamma=p["ln2_g"], ln_beta=p["ln2_b"],
                         out_dtype=jnp.bfloat16)
        x = fused_linear(h, p["w_ff2"], p["b_ff2"], residual=x,
                         out_dtype=jnp.float32)

    # --- classification head on CLS token ------------------------------------
    logits = fused_linear(x[:, 0, :], params["head_w"], params["head_b"],
                          out_dtype=jnp.float32)
    return logits


# ----------------------------------------------------------------------------
# Deterministic parameter construction
# ----------------------------------------------------------------------------

def init_params(key, *, in_ch, patch, embed, num_heads, num_layers, ffn_mult,
                num_class, num_tokens):
    def nrm(k, shape, scale=0.02):
        return scale * jax.random.normal(k, shape, dtype=jnp.float32)

    keys = jax.random.split(key, 8 + num_layers)
    params = {
        "patch_w": nrm(keys[0], (in_ch * patch * patch, embed)),
        "patch_b": jnp.zeros((embed,), jnp.float32),
        "cls_token": nrm(keys[1], (1, 1, embed)),
        "pos_embed": nrm(keys[2], (num_tokens, embed)),
        "head_w": nrm(keys[3], (embed, num_class)),
        "head_b": jnp.zeros((num_class,), jnp.float32),
        "layers": [],
    }
    hidden = ffn_mult * embed
    dh = embed // num_heads
    qscale = 1.0 / math.sqrt(dh)   # softmax(QK^T/sqrt(dh)) scale folded into wq
    for layer in range(num_layers):
        lk = jax.random.split(keys[8 + layer], 6)
        wq, wk, wv = (nrm(lk[0], (embed, embed)), nrm(lk[1], (embed, embed)),
                      nrm(lk[2], (embed, embed)))
        bq = bk = bv = jnp.zeros((embed,), jnp.float32)
        params["layers"].append({
            "ln1_g": jnp.ones((embed,), jnp.float32),
            "ln1_b": jnp.zeros((embed,), jnp.float32),
            "w_qkv": jnp.concatenate([wq * qscale, wk, wv], axis=1),
            "b_qkv": jnp.concatenate([bq * qscale, bk, bv]),
            "wo": nrm(lk[3], (embed, embed)),
            "bo": jnp.zeros((embed,), jnp.float32),
            "ln2_g": jnp.ones((embed,), jnp.float32),
            "ln2_b": jnp.zeros((embed,), jnp.float32),
            "w_ff1": nrm(lk[4], (embed, hidden)),
            "b_ff1": jnp.zeros((hidden,), jnp.float32),
            "w_ff2": nrm(lk[5], (hidden, embed)),
            "b_ff2": jnp.zeros((embed,), jnp.float32),
        })
    return params


if __name__ == "__main__":
    # Small config consistent with the module's forward (embed_size / heads /
    # num_layers scaled down for a quick smoke test).
    B, C, H, W = 2, 3, 16, 16
    PATCH = 4
    EMBED = 32
    HEADS = 4
    LAYERS = 2
    NUM_CLASS = 10
    N_PATCHES = (H // PATCH) * (W // PATCH)
    N_TOKENS = N_PATCHES + 1

    key = jax.random.PRNGKey(0)
    k_img, k_par = jax.random.split(key)
    images = jax.random.normal(k_img, (B, C, H, W), dtype=jnp.float32)
    params = init_params(
        k_par, in_ch=C, patch=PATCH, embed=EMBED, num_heads=HEADS,
        num_layers=LAYERS, ffn_mult=4, num_class=NUM_CLASS,
        num_tokens=N_TOKENS)

    fwd = jax.jit(functools.partial(vit_forward, patch=PATCH,
                                    num_heads=HEADS, num_layers=LAYERS))
    logits = jax.block_until_ready(fwd(params, images))
    assert logits.shape == (B, NUM_CLASS)
    assert bool(jnp.all(jnp.isfinite(logits)))
    print("KERNEL_OK")
</pallas_src>

<mosaic_0001>
module attributes {stable_mosaic.version = 11 : i64} {
  func.func @_fused_matmul_kernel(%arg0: i32, %arg1: i32, %arg2: i32, %arg3: memref<48x128xf32, #tpu.memory_space<vmem>>, %arg4: memref<128x128xbf16, #tpu.memory_space<vmem>>, %arg5: memref<1x128xf32, #tpu.memory_space<vmem>>, %arg6: memref<1x128xf32, #tpu.memory_space<vmem>>, %arg7: memref<1x128xf32, #tpu.memory_space<vmem>>, %arg8: memref<48x128xbf16, #tpu.memory_space<vmem>>, %arg9: memref<48x128xf32, #tpu.memory_space<vmem>>) attributes {dimension_semantics = [#tpu.dimension_semantics<parallel>, #tpu.dimension_semantics<parallel>, #tpu.dimension_semantics<arbitrary>], iteration_bounds = array<i64: 1, 1, 1>, scalar_prefetch = 0 : i64, scratch_operands = 1 : i64, tpu.core_type = #tpu.core_type<tc>, window_params = [{transform_indices = @transform_0, window_bounds = array<i64: 48, 128>}, {transform_indices = @transform_1, window_bounds = array<i64: 128, 128>}, {transform_indices = @transform_2, window_bounds = array<i64: 1, 128>}, {pipeline_mode = #tpu.pipeline_mode<synchronous>, transform_indices = @transform_3, window_bounds = array<i64: 1, 128>}, {pipeline_mode = #tpu.pipeline_mode<synchronous>, transform_indices = @transform_4, window_bounds = array<i64: 1, 128>}, {transform_indices = @transform_5, window_bounds = array<i64: 48, 128>}]} {
    %c0_i32 = arith.constant 0 : i32
    %0 = arith.cmpi eq, %arg2, %c0_i32 : i32
    %1 = arith.extui %0 : i1 to i32
    %c0_i32_0 = arith.constant 0 : i32
    %2 = arith.cmpi ne, %1, %c0_i32_0 : i32
    scf.if %2 {
      %cst_19 = arith.constant 0.000000e+00 : f32
      %37 = vector.broadcast %cst_19 : f32 to vector<48x128xf32>
      %c0_20 = arith.constant 0 : index
      %c0_21 = arith.constant 0 : index
      %38 = vector.load %arg9[%c0_20, %c0_21] : memref<48x128xf32, #tpu.memory_space<vmem>>, vector<48x128xf32>
      tpu.vector_store %arg9[%c0_20, %c0_21], %37 {strides = array<i32>} : memref<48x128xf32, #tpu.memory_space<vmem>>, vector<48x128xf32>,
    } else {
    }
    %c0 = arith.constant 0 : index
    %c0_1 = arith.constant 0 : index
    %3 = vector.load %arg3[%c0, %c0_1] : memref<48x128xf32, #tpu.memory_space<vmem>>, vector<48x128xf32>
    %cst = arith.constant dense<0.000000e+00> : vector<48xf32>
    %4 = vector.multi_reduction <add>, %3, %cst [1] : vector<48x128xf32> to vector<48xf32>
    %5 = vector.shape_cast %4 : vector<48xf32> to vector<48x1xf32>
    %6 = arith.mulf %3, %3 : vector<48x128xf32>
    %cst_2 = arith.constant dense<0.000000e+00> : vector<48xf32>
    %7 = vector.multi_reduction <add>, %6, %cst_2 [1] : vector<48x128xf32> to vector<48xf32>
    %8 = vector.shape_cast %7 : vector<48xf32> to vector<48x1xf32>
    %cst_3 = arith.constant 3.125000e-02 : f32
    %9 = vector.broadcast %cst_3 : f32 to vector<48x1xf32>
    %10 = arith.mulf %5, %9 : vector<48x1xf32>
    %cst_4 = arith.constant 3.125000e-02 : f32
    %11 = vector.broadcast %cst_4 : f32 to vector<48x1xf32>
    %12 = arith.mulf %8, %11 : vector<48x1xf32>
    %13 = arith.mulf %10, %10 : vector<48x1xf32>
    %14 = arith.subf %12, %13 : vector<48x1xf32>
    %15 = vector.broadcast %10 : vector<48x1xf32> to vector<48x128xf32>
    %16 = arith.subf %3, %15 : vector<48x128xf32>
    %cst_5 = arith.constant 9.99999974E-6 : f32
    %17 = vector.broadcast %cst_5 : f32 to vector<48x1xf32>
    %18 = arith.addf %14, %17 : vector<48x1xf32>
    %19 = math.rsqrt %18 : vector<48x1xf32>
    %20 = vector.broadcast %19 : vector<48x1xf32> to vector<48x128xf32>
    %21 = arith.mulf %16, %20 : vector<48x128xf32>
    %c0_6 = arith.constant 0 : index
    %c0_7 = arith.constant 0 : index
    %22 = vector.load %arg6[%c0_6, %c0_7] : memref<1x128xf32, #tpu.memory_space<vmem>>, vector<1x128xf32>
    %23 = vector.broadcast %22 : vector<1x128xf32> to vector<48x128xf32>
    %24 = arith.mulf %21, %23 : vector<48x128xf32>
    %c0_8 = arith.constant 0 : index
    %c0_9 = arith.constant 0 : index
    %25 = vector.load %arg7[%c0_8, %c0_9] : memref<1x128xf32, #tpu.memory_space<vmem>>, vector<1x128xf32>
    %26 = vector.broadcast %25 : vector<1x128xf32> to vector<48x128xf32>
    %27 = arith.addf %24, %26 : vector<48x128xf32>
    %28 = arith.truncf %27 : vector<48x128xf32> to vector<48x128xbf16>
    %c0_10 = arith.constant 0 : index
    %c0_11 = arith.constant 0 : index
    %29 = vector.load %arg4[%c0_10, %c0_11] : memref<128x128xbf16, #tpu.memory_space<vmem>>, vector<128x128xbf16>
    %c0_12 = arith.constant 0 : index
    %c0_13 = arith.constant 0 : index
    %30 = vector.load %arg9[%c0_12, %c0_13] : memref<48x128xf32, #tpu.memory_space<vmem>>, vector<48x128xf32>
    %cst_14 = arith.constant dense<0.000000e+00> : vector<48x128xf32>
    %31 = tpu.matmul %28, %29, %cst_14 {dimension_numbers = #tpu.dot_dimension_numbers<[1], [0], [0], [1], [0, 0, 1, 1], [], []>} : vector<48x128xbf16>, vector<128x128xbf16>, vector<48x128xf32> -> vector<48x128xf32>
    %32 = arith.addf %30, %31 : vector<48x128xf32>
    %c0_15 = arith.constant 0 : index
    %c0_16 = arith.constant 0 : index
    %33 = vector.load %arg9[%c0_15, %c0_16] : memref<48x128xf32, #tpu.memory_space<vmem>>, vector<48x128xf32>
    tpu.vector_store %arg9[%c0_15, %c0_16], %32 {strides = array<i32>} : memref<48x128xf32, #tpu.memory_space<vmem>>, vector<48x128xf32>,
    %c0_i32_17 = arith.constant 0 : i32
    %34 = arith.cmpi eq, %arg2, %c0_i32_17 : i32
    %35 = arith.extui %34 : i1 to i32
    %c0_i32_18 = arith.constant 0 : i32
    %36 = arith.cmpi ne, %35, %c0_i32_18 : i32
    scf.if %36 {
      %c0_19 = arith.constant 0 : index
      %c0_20 = arith.constant 0 : index
      %37 = vector.load %arg9[%c0_19, %c0_20] : memref<48x128xf32, #tpu.memory_space<vmem>>, vector<48x128xf32>
      %c0_21 = arith.constant 0 : index
      %c0_22 = arith.constant 0 : index
      %38 = vector.load %arg5[%c0_21, %c0_22] : memref<1x128xf32, #tpu.memory_space<vmem>>, vector<1x128xf32>
      %39 = vector.broadcast %38 : vector<1x128xf32> to vector<48x128xf32>
      %40 = arith.addf %37, %39 : vector<48x128xf32>
      %41 = arith.truncf %40 : vector<48x128xf32> to vector<48x128xbf16>
      %c0_23 = arith.constant 0 : index
      %c0_24 = arith.constant 0 : index
      %42 = vector.load %arg8[%c0_23, %c0_24] : memref<48x128xbf16, #tpu.memory_space<vmem>>, vector<48x128xbf16>
      tpu.vector_store %arg8[%c0_23, %c0_24], %41 {strides = array<i32>} : memref<48x128xbf16, #tpu.memory_space<vmem>>, vector<48x128xbf16>,
    } else {
    }
    return
  }
  func.func @transform_0(%arg0: i32, %arg1: i32, %arg2: i32) -> (i32, i32) {
    %c0_i32 = arith.constant 0 : i32
    return %arg0, %arg2 : i32, i32
  }
  func.func @transform_1(%arg0: i32, %arg1: i32, %arg2: i32) -> (i32, i32) {
    %c0_i32 = arith.constant 0 : i32
    return %arg2, %arg1 : i32, i32
  }
  func.func @transform_2(%arg0: i32, %arg1: i32, %arg2: i32) -> (i32, i32) {
    %c0_i32 = arith.constant 0 : i32
    %c0_i32_0 = arith.constant 0 : i32
    return %c0_i32, %arg1 : i32, i32
  }
  func.func @transform_3(%arg0: i32, %arg1: i32, %arg2: i32) -> (i32, i32) {
    %c0_i32 = arith.constant 0 : i32
    %c0_i32_0 = arith.constant 0 : i32
    %c0_i32_1 = arith.constant 0 : i32
    return %c0_i32, %c0_i32_0 : i32, i32
  }
  func.func @transform_4(%arg0: i32, %arg1: i32, %arg2: i32) -> (i32, i32) {
    %c0_i32 = arith.constant 0 : i32
    %c0_i32_0 = arith.constant 0 : i32
    %c0_i32_1 = arith.constant 0 : i32
    return %c0_i32, %c0_i32_0 : i32, i32
  }
  func.func @transform_5(%arg0: i32, %arg1: i32, %arg2: i32) -> (i32, i32) {
    %c0_i32 = arith.constant 0 : i32
    return %arg0, %arg1 : i32, i32
  }
}

module attributes {stable_mosaic.version = 11 : i64} {
  func.func @_fused_matmul_kernel(%arg0: i32, %arg1: i32, %arg2: i32, %arg3: memref<32x128xbf16, #tpu.memory_space<vmem>>, %arg4: memref<128x128xbf16, #tpu.memory_space<vmem>>, %arg5: memref<1x128xf32, #tpu.memory_space<vmem>>, %arg6: memref<32x128xf32, #tpu.memory_space<vmem>>, %arg7: memref<32x128xf32, #tpu.memory_space<vmem>>) attributes {dimension_semantics = [#tpu.dimension_semantics<parallel>, #tpu.dimension_semantics<parallel>, #tpu.dimension_semantics<arbitrary>], iteration_bounds = array<i64: 1, 1, 1>, scalar_prefetch = 0 : i64, scratch_operands = 1 : i64, tpu.core_type = #tpu.core_type<tc>, window_params = [{transform_indices = @transform_0, window_bounds = array<i64: 32, 128>}, {transform_indices = @transform_1, window_bounds = array<i64: 128, 128>}, {transform_indices = @transform_2, window_bounds = array<i64: 1, 128>}, {transform_indices = @transform_3, window_bounds = array<i64: 32, 128>}]} {
    %c0_i32 = arith.constant 0 : i32
    %0 = arith.cmpi eq, %arg2, %c0_i32 : i32
    %1 = arith.extui %0 : i1 to i32
    %c0_i32_0 = arith.constant 0 : i32
    %2 = arith.cmpi ne, %1, %c0_i32_0 : i32
    scf.if %2 {
      %cst_10 = arith.constant 0.000000e+00 : f32
      %12 = vector.broadcast %cst_10 : f32 to vector<32x128xf32>
      %c0_11 = arith.constant 0 : index
      %c0_12 = arith.constant 0 : index
      %13 = vector.load %arg7[%c0_11, %c0_12] : memref<32x128xf32, #tpu.memory_space<vmem>>, vector<32x128xf32>
      tpu.vector_store %arg7[%c0_11, %c0_12], %12 {strides = array<i32>} : memref<32x128xf32, #tpu.memory_space<vmem>>, vector<32x128xf32>,
    } else {
    }
    %c0 = arith.constant 0 : index
    %c0_1 = arith.constant 0 : index
    %3 = vector.load %arg3[%c0, %c0_1] : memref<32x128xbf16, #tpu.memory_space<vmem>>, vector<32x128xbf16>
    %c0_2 = arith.constant 0 : index
    %c0_3 = arith.constant 0 : index
    %4 = vector.load %arg4[%c0_2, %c0_3] : memref<128x128xbf16, #tpu.memory_space<vmem>>, vector<128x128xbf16>
    %c0_4 = arith.constant 0 : index
    %c0_5 = arith.constant 0 : index
    %5 = vector.load %arg7[%c0_4, %c0_5] : memref<32x128xf32, #tpu.memory_space<vmem>>, vector<32x128xf32>
    %cst = arith.constant dense<0.000000e+00> : vector<32x128xf32>
    %6 = tpu.matmul %3, %4, %cst {dimension_numbers = #tpu.dot_dimension_numbers<[1], [0], [0], [1], [0, 0, 1, 1], [], []>} : vector<32x128xbf16>, vector<128x128xbf16>, vector<32x128xf32> -> vector<32x128xf32>
    %7 = arith.addf %5, %6 : vector<32x128xf32>
    %c0_6 = arith.constant 0 : index
    %c0_7 = arith.constant 0 : index
    %8 = vector.load %arg7[%c0_6, %c0_7] : memref<32x128xf32, #tpu.memory_space<vmem>>, vector<32x128xf32>
    tpu.vector_store %arg7[%c0_6, %c0_7], %7 {strides = array<i32>} : memref<32x128xf32, #tpu.memory_space<vmem>>, vector<32x128xf32>,
    %c0_i32_8 = arith.constant 0 : i32
    %9 = arith.cmpi eq, %arg2, %c0_i32_8 : i32
    %10 = arith.extui %9 : i1 to i32
    %c0_i32_9 = arith.constant 0 : i32
    %11 = arith.cmpi ne, %10, %c0_i32_9 : i32
    scf.if %11 {
      %c0_10 = arith.constant 0 : index
      %c0_11 = arith.constant 0 : index
      %12 = vector.load %arg7[%c0_10, %c0_11] : memref<32x128xf32, #tpu.memory_space<vmem>>, vector<32x128xf32>
      %c0_12 = arith.constant 0 : index
      %c0_13 = arith.constant 0 : index
      %13 = vector.load %arg5[%c0_12, %c0_13] : memref<1x128xf32, #tpu.memory_space<vmem>>, vector<1x128xf32>
      %14 = vector.broadcast %13 : vector<1x128xf32> to vector<32x128xf32>
      %15 = arith.addf %12, %14 : vector<32x128xf32>
      %c0_14 = arith.constant 0 : index
      %c0_15 = arith.constant 0 : index
      %16 = vector.load %arg6[%c0_14, %c0_15] : memref<32x128xf32, #tpu.memory_space<vmem>>, vector<32x128xf32>
      tpu.vector_store %arg6[%c0_14, %c0_15], %15 {strides = array<i32>} : memref<32x128xf32, #tpu.memory_space<vmem>>, vector<32x128xf32>,
    } else {
    }
    return
  }
  func.func @transform_0(%arg0: i32, %arg1: i32, %arg2: i32) -> (i32, i32) {
    %c0_i32 = arith.constant 0 : i32
    return %arg0, %arg2 : i32, i32
  }
  func.func @transform_1(%arg0: i32, %arg1: i32, %arg2: i32) -> (i32, i32) {
    %c0_i32 = arith.constant 0 : i32
    return %arg2, %arg1 : i32, i32
  }
  func.func @transform_2(%arg0: i32, %arg1: i32, %arg2: i32) -> (i32, i32) {
    %c0_i32 = arith.constant 0 : i32
    %c0_i32_0 = arith.constant 0 : i32
    return %c0_i32, %arg1 : i32, i32
  }
  func.func @transform_3(%arg0: i32, %arg1: i32, %arg2: i32) -> (i32, i32) {
    %c0_i32 = arith.constant 0 : i32
    return %arg0, %arg1 : i32, i32
  }
}

module attributes {stable_mosaic.version = 11 : i64} {
  func.func @_attention_kernel(%arg0: i32, %arg1: memref<1x24x96xbf16, #tpu.memory_space<vmem>>, %arg2: memref<1x24x32xbf16, #tpu.memory_space<vmem>>) attributes {dimension_semantics = [#tpu.dimension_semantics<parallel>], iteration_bounds = array<i64: 2>, scalar_prefetch = 0 : i64, scratch_operands = 0 : i64, tpu.core_type = #tpu.core_type<tc>, window_params = [{transform_indices = @transform_0, window_bounds = array<i64: 1, 24, 96>}, {transform_indices = @transform_1, window_bounds = array<i64: 1, 24, 32>}]} {
    %c0 = arith.constant 0 : index
    %c0_0 = arith.constant 0 : index
    %c0_1 = arith.constant 0 : index
    %0 = vector.load %arg1[%c0, %c0_0, %c0_1] : memref<1x24x96xbf16, #tpu.memory_space<vmem>>, vector<1x24x96xbf16>
    %1 = vector.shape_cast %0 : vector<1x24x96xbf16> to vector<24x96xbf16>
    %2 = tpu.iota {dimensions = array<i32: 1>} : vector<24x24xi32>
    %c17_i32 = arith.constant 17 : i32
    %3 = vector.broadcast %c17_i32 : i32 to vector<24x24xi32>
    %4 = arith.cmpi slt, %2, %3 : vector<24x24xi32>
    %5 = vector.extract_strided_slice %1 {offsets = [0, 0], sizes = [24, 8], strides = [1, 1]} : vector<24x96xbf16> to vector<24x8xbf16>
    %6 = vector.extract_strided_slice %1 {offsets = [0, 32], sizes = [24, 8], strides = [1, 1]} : vector<24x96xbf16> to vector<24x8xbf16>
    %7 = vector.extract_strided_slice %1 {offsets = [0, 64], sizes = [24, 8], strides = [1, 1]} : vector<24x96xbf16> to vector<24x8xbf16>
    %cst = arith.constant dense<0.000000e+00> : vector<24x24xf32>
    %8 = tpu.matmul %5, %6, %cst {dimension_numbers = #tpu.dot_dimension_numbers<[1], [1], [0], [0], [0, 0, 1, 0], [], []>} : vector<24x8xbf16>, vector<24x8xbf16>, vector<24x24xf32> -> vector<24x24xf32>
    %cst_2 = arith.constant -1.000000e+30 : f32
    %9 = vector.broadcast %cst_2 : f32 to vector<24x24xf32>
    %10 = arith.select %4, %8, %9 : vector<24x24xi1>, vector<24x24xf32>
    %cst_3 = arith.constant dense<0xFF800000> : vector<24xf32>
    %11 = vector.multi_reduction <maximumf>, %10, %cst_3 [1] : vector<24x24xf32> to vector<24xf32>
    %12 = vector.shape_cast %11 : vector<24xf32> to vector<24x1xf32>
    %13 = vector.broadcast %12 : vector<24x1xf32> to vector<24x24xf32>
    %14 = arith.subf %10, %13 : vector<24x24xf32>
    %15 = math.exp %14 : vector<24x24xf32>
    %cst_4 = arith.constant dense<0.000000e+00> : vector<24xf32>
    %16 = vector.multi_reduction <add>, %15, %cst_4 [1] : vector<24x24xf32> to vector<24xf32>
    %17 = vector.shape_cast %16 : vector<24xf32> to vector<24x1xf32>
    %18 = tpu.reciprocal %17 {approx = true} : vector<24x1xf32> -> vector<24x1xf32>
    %19 = vector.broadcast %18 : vector<24x1xf32> to vector<24x24xf32>
    %20 = arith.mulf %15, %19 : vector<24x24xf32>
    %21 = arith.truncf %20 : vector<24x24xf32> to vector<24x24xbf16>
    %cst_5 = arith.constant dense<0.000000e+00> : vector<24x8xf32>
    %22 = tpu.matmul %21, %7, %cst_5 {dimension_numbers = #tpu.dot_dimension_numbers<[1], [0], [0], [1], [0, 0, 1, 1], [], []>} : vector<24x24xbf16>, vector<24x8xbf16>, vector<24x8xf32> -> vector<24x8xf32>
    %23 = vector.extract_strided_slice %1 {offsets = [0, 8], sizes = [24, 8], strides = [1, 1]} : vector<24x96xbf16> to vector<24x8xbf16>
    %24 = vector.extract_strided_slice %1 {offsets = [0, 40], sizes = [24, 8], strides = [1, 1]} : vector<24x96xbf16> to vector<24x8xbf16>
    %25 = vector.extract_strided_slice %1 {offsets = [0, 72], sizes = [24, 8], strides = [1, 1]} : vector<24x96xbf16> to vector<24x8xbf16>
    %cst_6 = arith.constant dense<0.000000e+00> : vector<24x24xf32>
    %26 = tpu.matmul %23, %24, %cst_6 {dimension_numbers = #tpu.dot_dimension_numbers<[1], [1], [0], [0], [0, 0, 1, 0], [], []>} : vector<24x8xbf16>, vector<24x8xbf16>, vector<24x24xf32> -> vector<24x24xf32>
    %cst_7 = arith.constant -1.000000e+30 : f32
    %27 = vector.broadcast %cst_7 : f32 to vector<24x24xf32>
    %28 = arith.select %4, %26, %27 : vector<24x24xi1>, vector<24x24xf32>
    %cst_8 = arith.constant dense<0xFF800000> : vector<24xf32>
    %29 = vector.multi_reduction <maximumf>, %28, %cst_8 [1] : vector<24x24xf32> to vector<24xf32>
    %30 = vector.shape_cast %29 : vector<24xf32> to vector<24x1xf32>
    %31 = vector.broadcast %30 : vector<24x1xf32> to vector<24x24xf32>
    %32 = arith.subf %28, %31 : vector<24x24xf32>
    %33 = math.exp %32 : vector<24x24xf32>
    %cst_9 = arith.constant dense<0.000000e+00> : vector<24xf32>
    %34 = vector.multi_reduction <add>, %33, %cst_9 [1] : vector<24x24xf32> to vector<24xf32>
    %35 = vector.shape_cast %34 : vector<24xf32> to vector<24x1xf32>
    %36 = tpu.reciprocal %35 {approx = true} : vector<24x1xf32> -> vector<24x1xf32>
    %37 = vector.broadcast %36 : vector<24x1xf32> to vector<24x24xf32>
    %38 = arith.mulf %33, %37 : vector<24x24xf32>
    %39 = arith.truncf %38 : vector<24x24xf32> to vector<24x24xbf16>
    %cst_10 = arith.constant dense<0.000000e+00> : vector<24x8xf32>
    %40 = tpu.matmul %39, %25, %cst_10 {dimension_numbers = #tpu.dot_dimension_numbers<[1], [0], [0], [1], [0, 0, 1, 1], [], []>} : vector<24x24xbf16>, vector<24x8xbf16>, vector<24x8xf32> -> vector<24x8xf32>
    %41 = vector.extract_strided_slice %1 {offsets = [0, 16], sizes = [24, 8], strides = [1, 1]} : vector<24x96xbf16> to vector<24x8xbf16>
    %42 = vector.extract_strided_slice %1 {offsets = [0, 48], sizes = [24, 8], strides = [1, 1]} : vector<24x96xbf16> to vector<24x8xbf16>
    %43 = vector.extract_strided_slice %1 {offsets = [0, 80], sizes = [24, 8], strides = [1, 1]} : vector<24x96xbf16> to vector<24x8xbf16>
    %cst_11 = arith.constant dense<0.000000e+00> : vector<24x24xf32>
    %44 = tpu.matmul %41, %42, %cst_11 {dimension_numbers = #tpu.dot_dimension_numbers<[1], [1], [0], [0], [0, 0, 1, 0], [], []>} : vector<24x8xbf16>, vector<24x8xbf16>, vector<24x24xf32> -> vector<24x24xf32>
    %cst_12 = arith.constant -1.000000e+30 : f32
    %45 = vector.broadcast %cst_12 : f32 to vector<24x24xf32>
    %46 = arith.select %4, %44, %45 : vector<24x24xi1>, vector<24x24xf32>
    %cst_13 = arith.constant dense<0xFF800000> : vector<24xf32>
    %47 = vector.multi_reduction <maximumf>, %46, %cst_13 [1] : vector<24x24xf32> to vector<24xf32>
    %48 = vector.shape_cast %47 : vector<24xf32> to vector<24x1xf32>
    %49 = vector.broadcast %48 : vector<24x1xf32> to vector<24x24xf32>
    %50 = arith.subf %46, %49 : vector<24x24xf32>
    %51 = math.exp %50 : vector<24x24xf32>
    %cst_14 = arith.constant dense<0.000000e+00> : vector<24xf32>
    %52 = vector.multi_reduction <add>, %51, %cst_14 [1] : vector<24x24xf32> to vector<24xf32>
    %53 = vector.shape_cast %52 : vector<24xf32> to vector<24x1xf32>
    %54 = tpu.reciprocal %53 {approx = true} : vector<24x1xf32> -> vector<24x1xf32>
    %55 = vector.broadcast %54 : vector<24x1xf32> to vector<24x24xf32>
    %56 = arith.mulf %51, %55 : vector<24x24xf32>
    %57 = arith.truncf %56 : vector<24x24xf32> to vector<24x24xbf16>
    %cst_15 = arith.constant dense<0.000000e+00> : vector<24x8xf32>
    %58 = tpu.matmul %57, %43, %cst_15 {dimension_numbers = #tpu.dot_dimension_numbers<[1], [0], [0], [1], [0, 0, 1, 1], [], []>} : vector<24x24xbf16>, vector<24x8xbf16>, vector<24x8xf32> -> vector<24x8xf32>
    %59 = vector.extract_strided_slice %1 {offsets = [0, 24], sizes = [24, 8], strides = [1, 1]} : vector<24x96xbf16> to vector<24x8xbf16>
    %60 = vector.extract_strided_slice %1 {offsets = [0, 56], sizes = [24, 8], strides = [1, 1]} : vector<24x96xbf16> to vector<24x8xbf16>
    %61 = vector.extract_strided_slice %1 {offsets = [0, 88], sizes = [24, 8], strides = [1, 1]} : vector<24x96xbf16> to vector<24x8xbf16>
    %cst_16 = arith.constant dense<0.000000e+00> : vector<24x24xf32>
    %62 = tpu.matmul %59, %60, %cst_16 {dimension_numbers = #tpu.dot_dimension_numbers<[1], [1], [0], [0], [0, 0, 1, 0], [], []>} : vector<24x8xbf16>, vector<24x8xbf16>, vector<24x24xf32> -> vector<24x24xf32>
    %cst_17 = arith.constant -1.000000e+30 : f32
    %63 = vector.broadcast %cst_17 : f32 to vector<24x24xf32>
    %64 = arith.select %4, %62, %63 : vector<24x24xi1>, vector<24x24xf32>
    %cst_18 = arith.constant dense<0xFF800000> : vector<24xf32>
    %65 = vector.multi_reduction <maximumf>, %64, %cst_18 [1] : vector<24x24xf32> to vector<24xf32>
    %66 = vector.shape_cast %65 : vector<24xf32> to vector<24x1xf32>
    %67 = vector.broadcast %66 : vector<24x1xf32> to vector<24x24xf32>
    %68 = arith.subf %64, %67 : vector<24x24xf32>
    %69 = math.exp %68 : vector<24x24xf32>
    %cst_19 = arith.constant dense<0.000000e+00> : vector<24xf32>
    %70 = vector.multi_reduction <add>, %69, %cst_19 [1] : vector<24x24xf32> to vector<24xf32>
    %71 = vector.shape_cast %70 : vector<24xf32> to vector<24x1xf32>
    %72 = tpu.reciprocal %71 {approx = true} : vector<24x1xf32> -> vector<24x1xf32>
    %73 = vector.broadcast %72 : vector<24x1xf32> to vector<24x24xf32>
    %74 = arith.mulf %69, %73 : vector<24x24xf32>
    %75 = arith.truncf %74 : vector<24x24xf32> to vector<24x24xbf16>
    %cst_20 = arith.constant dense<0.000000e+00> : vector<24x8xf32>
    %76 = tpu.matmul %75, %61, %cst_20 {dimension_numbers = #tpu.dot_dimension_numbers<[1], [0], [0], [1], [0, 0, 1, 1], [], []>} : vector<24x24xbf16>, vector<24x8xbf16>, vector<24x8xf32> -> vector<24x8xf32>
    %77 = tpu.concatenate %22, %40, %58, %76 in 1 : vector<24x8xf32>, vector<24x8xf32>, vector<24x8xf32>, vector<24x8xf32> -> vector<24x32xf32>
    %78 = arith.truncf %77 : vector<24x32xf32> to vector<24x32xbf16>
    %c0_21 = arith.constant 0 : index
    %c0_22 = arith.constant 0 : index
    %c0_23 = arith.constant 0 : index
    %79 = vector.load %arg2[%c0_21, %c0_22, %c0_23] : memref<1x24x32xbf16, #tpu.memory_space<vmem>>, vector<1x24x32xbf16>
    %80 = vector.shape_cast %79 : vector<1x24x32xbf16> to vector<24x32xbf16>
    %81 = vector.shape_cast %78 : vector<24x32xbf16> to vector<1x24x32xbf16>
    tpu.vector_store %arg2[%c0_21, %c0_22, %c0_23], %81 {strides = array<i32>} : memref<1x24x32xbf16, #tpu.memory_space<vmem>>, vector<1x24x32xbf16>,
    return
  }
  func.func @transform_0(%arg0: i32) -> (i32, i32, i32) {
    %c0_i32 = arith.constant 0 : i32
    %c0_i32_0 = arith.constant 0 : i32
    %c0_i32_1 = arith.constant 0 : i32
    return %arg0, %c0_i32, %c0_i32_0 : i32, i32, i32
  }
  func.func @transform_1(%arg0: i32) -> (i32, i32, i32) {
    %c0_i32 = arith.constant 0 : i32
    %c0_i32_0 = arith.constant 0 : i32
    %c0_i32_1 = arith.constant 0 : i32
    return %arg0, %c0_i32, %c0_i32_0 : i32, i32, i32
  }
}

module attributes {stable_mosaic.version = 11 : i64} {
  func.func @_fused_matmul_kernel(%arg0: i32, %arg1: i32, %arg2: i32, %arg3: memref<48x128xbf16, #tpu.memory_space<vmem>>, %arg4: memref<128x128xbf16, #tpu.memory_space<vmem>>, %arg5: memref<1x128xf32, #tpu.memory_space<vmem>>, %arg6: memref<48x128xf32, #tpu.memory_space<vmem>>, %arg7: memref<48x128xf32, #tpu.memory_space<vmem>>, %arg8: memref<48x128xf32, #tpu.memory_space<vmem>>) attributes {dimension_semantics = [#tpu.dimension_semantics<parallel>, #tpu.dimension_semantics<parallel>, #tpu.dimension_semantics<arbitrary>], iteration_bounds = array<i64: 1, 1, 1>, scalar_prefetch = 0 : i64, scratch_operands = 1 : i64, tpu.core_type = #tpu.core_type<tc>, window_params = [{transform_indices = @transform_0, window_bounds = array<i64: 48, 128>}, {transform_indices = @transform_1, window_bounds = array<i64: 128, 128>}, {transform_indices = @transform_2, window_bounds = array<i64: 1, 128>}, {transform_indices = @transform_3, window_bounds = array<i64: 48, 128>}, {transform_indices = @transform_4, window_bounds = array<i64: 48, 128>}]} {
    %c0_i32 = arith.constant 0 : i32
    %0 = arith.cmpi eq, %arg2, %c0_i32 : i32
    %1 = arith.extui %0 : i1 to i32
    %c0_i32_0 = arith.constant 0 : i32
    %2 = arith.cmpi ne, %1, %c0_i32_0 : i32
    scf.if %2 {
      %cst_10 = arith.constant 0.000000e+00 : f32
      %12 = vector.broadcast %cst_10 : f32 to vector<48x128xf32>
      %c0_11 = arith.constant 0 : index
      %c0_12 = arith.constant 0 : index
      %13 = vector.load %arg8[%c0_11, %c0_12] : memref<48x128xf32, #tpu.memory_space<vmem>>, vector<48x128xf32>
      tpu.vector_store %arg8[%c0_11, %c0_12], %12 {strides = array<i32>} : memref<48x128xf32, #tpu.memory_space<vmem>>, vector<48x128xf32>,
    } else {
    }
    %c0 = arith.constant 0 : index
    %c0_1 = arith.constant 0 : index
    %3 = vector.load %arg3[%c0, %c0_1] : memref<48x128xbf16, #tpu.memory_space<vmem>>, vector<48x128xbf16>
    %c0_2 = arith.constant 0 : index
    %c0_3 = arith.constant 0 : index
    %4 = vector.load %arg4[%c0_2, %c0_3] : memref<128x128xbf16, #tpu.memory_space<vmem>>, vector<128x128xbf16>
    %c0_4 = arith.constant 0 : index
    %c0_5 = arith.constant 0 : index
    %5 = vector.load %arg8[%c0_4, %c0_5] : memref<48x128xf32, #tpu.memory_space<vmem>>, vector<48x128xf32>
    %cst = arith.constant dense<0.000000e+00> : vector<48x128xf32>
    %6 = tpu.matmul %3, %4, %cst {dimension_numbers = #tpu.dot_dimension_numbers<[1], [0], [0], [1], [0, 0, 1, 1], [], []>} : vector<48x128xbf16>, vector<128x128xbf16>, vector<48x128xf32> -> vector<48x128xf32>
    %7 = arith.addf %5, %6 : vector<48x128xf32>
    %c0_6 = arith.constant 0 : index
    %c0_7 = arith.constant 0 : index
    %8 = vector.load %arg8[%c0_6, %c0_7] : memref<48x128xf32, #tpu.memory_space<vmem>>, vector<48x128xf32>
    tpu.vector_store %arg8[%c0_6, %c0_7], %7 {strides = array<i32>} : memref<48x128xf32, #tpu.memory_space<vmem>>, vector<48x128xf32>,
    %c0_i32_8 = arith.constant 0 : i32
    %9 = arith.cmpi eq, %arg2, %c0_i32_8 : i32
    %10 = arith.extui %9 : i1 to i32
    %c0_i32_9 = arith.constant 0 : i32
    %11 = arith.cmpi ne, %10, %c0_i32_9 : i32
    scf.if %11 {
      %c0_10 = arith.constant 0 : index
      %c0_11 = arith.constant 0 : index
      %12 = vector.load %arg8[%c0_10, %c0_11] : memref<48x128xf32, #tpu.memory_space<vmem>>, vector<48x128xf32>
      %c0_12 = arith.constant 0 : index
      %c0_13 = arith.constant 0 : index
      %13 = vector.load %arg5[%c0_12, %c0_13] : memref<1x128xf32, #tpu.memory_space<vmem>>, vector<1x128xf32>
      %14 = vector.broadcast %13 : vector<1x128xf32> to vector<48x128xf32>
      %15 = arith.addf %12, %14 : vector<48x128xf32>
      %c0_14 = arith.constant 0 : index
      %c0_15 = arith.constant 0 : index
      %16 = vector.load %arg6[%c0_14, %c0_15] : memref<48x128xf32, #tpu.memory_space<vmem>>, vector<48x128xf32>
      %17 = arith.addf %15, %16 : vector<48x128xf32>
      %c0_16 = arith.constant 0 : index
      %c0_17 = arith.constant 0 : index
      %18 = vector.load %arg7[%c0_16, %c0_17] : memref<48x128xf32, #tpu.memory_space<vmem>>, vector<48x128xf32>
      tpu.vector_store %arg7[%c0_16, %c0_17], %17 {strides = array<i32>} : memref<48x128xf32, #tpu.memory_space<vmem>>, vector<48x128xf32>,
    } else {
    }
    return
  }
  func.func @transform_0(%arg0: i32, %arg1: i32, %arg2: i32) -> (i32, i32) {
    %c0_i32 = arith.constant 0 : i32
    return %arg0, %arg2 : i32, i32
  }
  func.func @transform_1(%arg0: i32, %arg1: i32, %arg2: i32) -> (i32, i32) {
    %c0_i32 = arith.constant 0 : i32
    return %arg2, %arg1 : i32, i32
  }
  func.func @transform_2(%arg0: i32, %arg1: i32, %arg2: i32) -> (i32, i32) {
    %c0_i32 = arith.constant 0 : i32
    %c0_i32_0 = arith.constant 0 : i32
    return %c0_i32, %arg1 : i32, i32
  }
  func.func @transform_3(%arg0: i32, %arg1: i32, %arg2: i32) -> (i32, i32) {
    %c0_i32 = arith.constant 0 : i32
    return %arg0, %arg1 : i32, i32
  }
  func.func @transform_4(%arg0: i32, %arg1: i32, %arg2: i32) -> (i32, i32) {
    %c0_i32 = arith.constant 0 : i32
    return %arg0, %arg1 : i32, i32
  }
}

module attributes {stable_mosaic.version = 11 : i64} {
  func.func @_fused_matmul_kernel(%arg0: i32, %arg1: i32, %arg2: i32, %arg3: memref<48x128xf32, #tpu.memory_space<vmem>>, %arg4: memref<128x128xbf16, #tpu.memory_space<vmem>>, %arg5: memref<1x128xf32, #tpu.memory_space<vmem>>, %arg6: memref<1x128xf32, #tpu.memory_space<vmem>>, %arg7: memref<1x128xf32, #tpu.memory_space<vmem>>, %arg8: memref<48x128xbf16, #tpu.memory_space<vmem>>, %arg9: memref<48x128xf32, #tpu.memory_space<vmem>>) attributes {dimension_semantics = [#tpu.dimension_semantics<parallel>, #tpu.dimension_semantics<parallel>, #tpu.dimension_semantics<arbitrary>], iteration_bounds = array<i64: 1, 1, 1>, scalar_prefetch = 0 : i64, scratch_operands = 1 : i64, tpu.core_type = #tpu.core_type<tc>, window_params = [{transform_indices = @transform_0, window_bounds = array<i64: 48, 128>}, {transform_indices = @transform_1, window_bounds = array<i64: 128, 128>}, {transform_indices = @transform_2, window_bounds = array<i64: 1, 128>}, {pipeline_mode = #tpu.pipeline_mode<synchronous>, transform_indices = @transform_3, window_bounds = array<i64: 1, 128>}, {pipeline_mode = #tpu.pipeline_mode<synchronous>, transform_indices = @transform_4, window_bounds = array<i64: 1, 128>}, {transform_indices = @transform_5, window_bounds = array<i64: 48, 128>}]} {
    %c0_i32 = arith.constant 0 : i32
    %0 = arith.cmpi eq, %arg2, %c0_i32 : i32
    %1 = arith.extui %0 : i1 to i32
    %c0_i32_0 = arith.constant 0 : i32
    %2 = arith.cmpi ne, %1, %c0_i32_0 : i32
    scf.if %2 {
      %cst_19 = arith.constant 0.000000e+00 : f32
      %37 = vector.broadcast %cst_19 : f32 to vector<48x128xf32>
      %c0_20 = arith.constant 0 : index
      %c0_21 = arith.constant 0 : index
      %38 = vector.load %arg9[%c0_20, %c0_21] : memref<48x128xf32, #tpu.memory_space<vmem>>, vector<48x128xf32>
      tpu.vector_store %arg9[%c0_20, %c0_21], %37 {strides = array<i32>} : memref<48x128xf32, #tpu.memory_space<vmem>>, vector<48x128xf32>,
    } else {
    }
    %c0 = arith.constant 0 : index
    %c0_1 = arith.constant 0 : index
    %3 = vector.load %arg3[%c0, %c0_1] : memref<48x128xf32, #tpu.memory_space<vmem>>, vector<48x128xf32>
    %cst = arith.constant dense<0.000000e+00> : vector<48xf32>
    %4 = vector.multi_reduction <add>, %3, %cst [1] : vector<48x128xf32> to vector<48xf32>
    %5 = vector.shape_cast %4 : vector<48xf32> to vector<48x1xf32>
    %6 = arith.mulf %3, %3 : vector<48x128xf32>
    %cst_2 = arith.constant dense<0.000000e+00> : vector<48xf32>
    %7 = vector.multi_reduction <add>, %6, %cst_2 [1] : vector<48x128xf32> to vector<48xf32>
    %8 = vector.shape_cast %7 : vector<48xf32> to vector<48x1xf32>
    %cst_3 = arith.constant 3.125000e-02 : f32
    %9 = vector.broadcast %cst_3 : f32 to vector<48x1xf32>
    %10 = arith.mulf %5, %9 : vector<48x1xf32>
    %cst_4 = arith.constant 3.125000e-02 : f32
    %11 = vector.broadcast %cst_4 : f32 to vector<48x1xf32>
    %12 = arith.mulf %8, %11 : vector<48x1xf32>
    %13 = arith.mulf %10, %10 : vector<48x1xf32>
    %14 = arith.subf %12, %13 : vector<48x1xf32>
    %15 = vector.broadcast %10 : vector<48x1xf32> to vector<48x128xf32>
    %16 = arith.subf %3, %15 : vector<48x128xf32>
    %cst_5 = arith.constant 9.99999974E-6 : f32
    %17 = vector.broadcast %cst_5 : f32 to vector<48x1xf32>
    %18 = arith.addf %14, %17 : vector<48x1xf32>
    %19 = math.rsqrt %18 : vector<48x1xf32>
    %20 = vector.broadcast %19 : vector<48x1xf32> to vector<48x128xf32>
    %21 = arith.mulf %16, %20 : vector<48x128xf32>
    %c0_6 = arith.constant 0 : index
    %c0_7 = arith.constant 0 : index
    %22 = vector.load %arg6[%c0_6, %c0_7] : memref<1x128xf32, #tpu.memory_space<vmem>>, vector<1x128xf32>
    %23 = vector.broadcast %22 : vector<1x128xf32> to vector<48x128xf32>
    %24 = arith.mulf %21, %23 : vector<48x128xf32>
    %c0_8 = arith.constant 0 : index
    %c0_9 = arith.constant 0 : index
    %25 = vector.load %arg7[%c0_8, %c0_9] : memref<1x128xf32, #tpu.memory_space<vmem>>, vector<1x128xf32>
    %26 = vector.broadcast %25 : vector<1x128xf32> to vector<48x128xf32>
    %27 = arith.addf %24, %26 : vector<48x128xf32>
    %28 = arith.truncf %27 : vector<48x128xf32> to vector<48x128xbf16>
    %c0_10 = arith.constant 0 : index
    %c0_11 = arith.constant 0 : index
    %29 = vector.load %arg4[%c0_10, %c0_11] : memref<128x128xbf16, #tpu.memory_space<vmem>>, vector<128x128xbf16>
    %c0_12 = arith.constant 0 : index
    %c0_13 = arith.constant 0 : index
    %30 = vector.load %arg9[%c0_12, %c0_13] : memref<48x128xf32, #tpu.memory_space<vmem>>, vector<48x128xf32>
    %cst_14 = arith.constant dense<0.000000e+00> : vector<48x128xf32>
    %31 = tpu.matmul %28, %29, %cst_14 {dimension_numbers = #tpu.dot_dimension_numbers<[1], [0], [0], [1], [0, 0, 1, 1], [], []>} : vector<48x128xbf16>, vector<128x128xbf16>, vector<48x128xf32> -> vector<48x128xf32>
    %32 = arith.addf %30, %31 : vector<48x128xf32>
    %c0_15 = arith.constant 0 : index
    %c0_16 = arith.constant 0 : index
    %33 = vector.load %arg9[%c0_15, %c0_16] : memref<48x128xf32, #tpu.memory_space<vmem>>, vector<48x128xf32>
    tpu.vector_store %arg9[%c0_15, %c0_16], %32 {strides = array<i32>} : memref<48x128xf32, #tpu.memory_space<vmem>>, vector<48x128xf32>,
    %c0_i32_17 = arith.constant 0 : i32
    %34 = arith.cmpi eq, %arg2, %c0_i32_17 : i32
    %35 = arith.extui %34 : i1 to i32
    %c0_i32_18 = arith.constant 0 : i32
    %36 = arith.cmpi ne, %35, %c0_i32_18 : i32
    scf.if %36 {
      %c0_19 = arith.constant 0 : index
      %c0_20 = arith.constant 0 : index
      %37 = vector.load %arg9[%c0_19, %c0_20] : memref<48x128xf32, #tpu.memory_space<vmem>>, vector<48x128xf32>
      %c0_21 = arith.constant 0 : index
      %c0_22 = arith.constant 0 : index
      %38 = vector.load %arg5[%c0_21, %c0_22] : memref<1x128xf32, #tpu.memory_space<vmem>>, vector<1x128xf32>
      %39 = vector.broadcast %38 : vector<1x128xf32> to vector<48x128xf32>
      %40 = arith.addf %37, %39 : vector<48x128xf32>
      %41 = arith.mulf %40, %40 : vector<48x128xf32>
      %42 = arith.mulf %40, %41 : vector<48x128xf32>
      %cst_23 = arith.constant 4.471500e-02 : f32
      %43 = vector.broadcast %cst_23 : f32 to vector<48x128xf32>
      %44 = arith.mulf %43, %42 : vector<48x128xf32>
      %45 = arith.addf %40, %44 : vector<48x128xf32>
      %cst_24 = arith.constant 0.797884583 : f32
      %46 = vector.broadcast %cst_24 : f32 to vector<48x128xf32>
      %47 = arith.mulf %46, %45 : vector<48x128xf32>
      %48 = math.tanh %47 : vector<48x128xf32>
      %cst_25 = arith.constant 1.000000e+00 : f32
      %49 = vector.broadcast %cst_25 : f32 to vector<48x128xf32>
      %50 = arith.addf %49, %48 : vector<48x128xf32>
      %cst_26 = arith.constant 5.000000e-01 : f32
      %51 = vector.broadcast %cst_26 : f32 to vector<48x128xf32>
      %52 = arith.mulf %51, %50 : vector<48x128xf32>
      %53 = arith.mulf %40, %52 : vector<48x128xf32>
      %54 = arith.truncf %53 : vector<48x128xf32> to vector<48x128xbf16>
      %c0_27 = arith.constant 0 : index
      %c0_28 = arith.constant 0 : index
      %55 = vector.load %arg8[%c0_27, %c0_28] : memref<48x128xbf16, #tpu.memory_space<vmem>>, vector<48x128xbf16>
      tpu.vector_store %arg8[%c0_27, %c0_28], %54 {strides = array<i32>} : memref<48x128xbf16, #tpu.memory_space<vmem>>, vector<48x128xbf16>,
    } else {
    }
    return
  }
  func.func @transform_0(%arg0: i32, %arg1: i32, %arg2: i32) -> (i32, i32) {
    %c0_i32 = arith.constant 0 : i32
    return %arg0, %arg2 : i32, i32
  }
  func.func @transform_1(%arg0: i32, %arg1: i32, %arg2: i32) -> (i32, i32) {
    %c0_i32 = arith.constant 0 : i32
    return %arg2, %arg1 : i32, i32
  }
  func.func @transform_2(%arg0: i32, %arg1: i32, %arg2: i32) -> (i32, i32) {
    %c0_i32 = arith.constant 0 : i32
    %c0_i32_0 = arith.constant 0 : i32
    return %c0_i32, %arg1 : i32, i32
  }
  func.func @transform_3(%arg0: i32, %arg1: i32, %arg2: i32) -> (i32, i32) {
    %c0_i32 = arith.constant 0 : i32
    %c0_i32_0 = arith.constant 0 : i32
    %c0_i32_1 = arith.constant 0 : i32
    return %c0_i32, %c0_i32_0 : i32, i32
  }
  func.func @transform_4(%arg0: i32, %arg1: i32, %arg2: i32) -> (i32, i32) {
    %c0_i32 = arith.constant 0 : i32
    %c0_i32_0 = arith.constant 0 : i32
    %c0_i32_1 = arith.constant 0 : i32
    return %c0_i32, %c0_i32_0 : i32, i32
  }
  func.func @transform_5(%arg0: i32, %arg1: i32, %arg2: i32) -> (i32, i32) {
    %c0_i32 = arith.constant 0 : i32
    return %arg0, %arg1 : i32, i32
  }
}

module attributes {stable_mosaic.version = 11 : i64} {
  func.func @_fused_matmul_kernel(%arg0: i32, %arg1: i32, %arg2: i32, %arg3: memref<8x128xbf16, #tpu.memory_space<vmem>>, %arg4: memref<128x128xbf16, #tpu.memory_space<vmem>>, %arg5: memref<1x128xf32, #tpu.memory_space<vmem>>, %arg6: memref<8x128xf32, #tpu.memory_space<vmem>>, %arg7: memref<8x128xf32, #tpu.memory_space<vmem>>) attributes {dimension_semantics = [#tpu.dimension_semantics<parallel>, #tpu.dimension_semantics<parallel>, #tpu.dimension_semantics<arbitrary>], iteration_bounds = array<i64: 1, 1, 1>, scalar_prefetch = 0 : i64, scratch_operands = 1 : i64, tpu.core_type = #tpu.core_type<tc>, window_params = [{transform_indices = @transform_0, window_bounds = array<i64: 8, 128>}, {transform_indices = @transform_1, window_bounds = array<i64: 128, 128>}, {transform_indices = @transform_2, window_bounds = array<i64: 1, 128>}, {transform_indices = @transform_3, window_bounds = array<i64: 8, 128>}]} {
    %c0_i32 = arith.constant 0 : i32
    %0 = arith.cmpi eq, %arg2, %c0_i32 : i32
    %1 = arith.extui %0 : i1 to i32
    %c0_i32_0 = arith.constant 0 : i32
    %2 = arith.cmpi ne, %1, %c0_i32_0 : i32
    scf.if %2 {
      %cst_10 = arith.constant 0.000000e+00 : f32
      %12 = vector.broadcast %cst_10 : f32 to vector<8x128xf32>
      %c0_11 = arith.constant 0 : index
      %c0_12 = arith.constant 0 : index
      %13 = vector.load %arg7[%c0_11, %c0_12] : memref<8x128xf32, #tpu.memory_space<vmem>>, vector<8x128xf32>
      tpu.vector_store %arg7[%c0_11, %c0_12], %12 {strides = array<i32>} : memref<8x128xf32, #tpu.memory_space<vmem>>, vector<8x128xf32>,
    } else {
    }
    %c0 = arith.constant 0 : index
    %c0_1 = arith.constant 0 : index
    %3 = vector.load %arg3[%c0, %c0_1] : memref<8x128xbf16, #tpu.memory_space<vmem>>, vector<8x128xbf16>
    %c0_2 = arith.constant 0 : index
    %c0_3 = arith.constant 0 : index
    %4 = vector.load %arg4[%c0_2, %c0_3] : memref<128x128xbf16, #tpu.memory_space<vmem>>, vector<128x128xbf16>
    %c0_4 = arith.constant 0 : index
    %c0_5 = arith.constant 0 : index
    %5 = vector.load %arg7[%c0_4, %c0_5] : memref<8x128xf32, #tpu.memory_space<vmem>>, vector<8x128xf32>
    %cst = arith.constant dense<0.000000e+00> : vector<8x128xf32>
    %6 = tpu.matmul %3, %4, %cst {dimension_numbers = #tpu.dot_dimension_numbers<[1], [0], [0], [1], [0, 0, 1, 1], [], []>} : vector<8x128xbf16>, vector<128x128xbf16>, vector<8x128xf32> -> vector<8x128xf32>
    %7 = arith.addf %5, %6 : vector<8x128xf32>
    %c0_6 = arith.constant 0 : index
    %c0_7 = arith.constant 0 : index
    %8 = vector.load %arg7[%c0_6, %c0_7] : memref<8x128xf32, #tpu.memory_space<vmem>>, vector<8x128xf32>
    tpu.vector_store %arg7[%c0_6, %c0_7], %7 {strides = array<i32>} : memref<8x128xf32, #tpu.memory_space<vmem>>, vector<8x128xf32>,
    %c0_i32_8 = arith.constant 0 : i32
    %9 = arith.cmpi eq, %arg2, %c0_i32_8 : i32
    %10 = arith.extui %9 : i1 to i32
    %c0_i32_9 = arith.constant 0 : i32
    %11 = arith.cmpi ne, %10, %c0_i32_9 : i32
    scf.if %11 {
      %c0_10 = arith.constant 0 : index
      %c0_11 = arith.constant 0 : index
      %12 = vector.load %arg7[%c0_10, %c0_11] : memref<8x128xf32, #tpu.memory_space<vmem>>, vector<8x128xf32>
      %c0_12 = arith.constant 0 : index
      %c0_13 = arith.constant 0 : index
      %13 = vector.load %arg5[%c0_12, %c0_13] : memref<1x128xf32, #tpu.memory_space<vmem>>, vector<1x128xf32>
      %14 = vector.broadcast %13 : vector<1x128xf32> to vector<8x128xf32>
      %15 = arith.addf %12, %14 : vector<8x128xf32>
      %c0_14 = arith.constant 0 : index
      %c0_15 = arith.constant 0 : index
      %16 = vector.load %arg6[%c0_14, %c0_15] : memref<8x128xf32, #tpu.memory_space<vmem>>, vector<8x128xf32>
      tpu.vector_store %arg6[%c0_14, %c0_15], %15 {strides = array<i32>} : memref<8x128xf32, #tpu.memory_space<vmem>>, vector<8x128xf32>,
    } else {
    }
    return
  }
  func.func @transform_0(%arg0: i32, %arg1: i32, %arg2: i32) -> (i32, i32) {
    %c0_i32 = arith.constant 0 : i32
    return %arg0, %arg2 : i32, i32
  }
  func.func @transform_1(%arg0: i32, %arg1: i32, %arg2: i32) -> (i32, i32) {
    %c0_i32 = arith.constant 0 : i32
    return %arg2, %arg1 : i32, i32
  }
  func.func @transform_2(%arg0: i32, %arg1: i32, %arg2: i32) -> (i32, i32) {
    %c0_i32 = arith.constant 0 : i32
    %c0_i32_0 = arith.constant 0 : i32
    return %c0_i32, %arg1 : i32, i32
  }
  func.func @transform_3(%arg0: i32, %arg1: i32, %arg2: i32) -> (i32, i32) {
    %c0_i32 = arith.constant 0 : i32
    return %arg0, %arg1 : i32, i32
  }
}

</mosaic_0001>

<bundles_post_ra>
// kernel: vit_forward.12
= control target key start
LH: loop header
LB: loop body
LE: loop exit
PB: predicated region body
PF: predicated region fallthrough
CT: control target
= control target key end

     0   :  { %s280_s1 = inlined_call_operand.vmem [shape: bf16[128,128], index: 1, kind: input, shape index: {}]   ;;  %s281_s2 = inlined_call_operand.vmem [shape: f32[1,128], index: 2, kind: input, shape index: {}]   ;;  %s282_s0 = inlined_call_operand.vmem [shape: bf16[32,128], index: 0, kind: input, shape index: {}]   ;;  %s283_s3 = inlined_call_operand.vmem [shape: f32[32,128], index: 3, kind: output, shape index: {}]  }
   0x1   :  { %v205_v0 = vld [vmem:[%s280_s1 + $0x38] sm:$0xff]  ;;  %v204_v1 = vld [vmem:[%s280_s1 + $0x30] sm:$0xff]  ;;  %v203_v2 = vld [vmem:[%s280_s1 + $0x28] sm:$0xff] }
   0x2   :  { %106 = vmatpush.bf16.msra.mxu0 %v205_v0  ;;  %206 = vmatpush.bf16.msra.mxu1 %v205_v0  ;;  %v202_v3 = vld [vmem:[%s280_s1 + $0x20] sm:$0xff]  ;;  %v201_v4 = vld [vmem:[%s280_s1 + $0x18] sm:$0xff]  ;;  %v200_v5 = vld [vmem:[%s280_s1 + $0x10] sm:$0xff] }
   0x3   :  { %v199_v6 = vld [vmem:[%s280_s1 + $0x8] sm:$0xff]  ;;  %v198_v7 = vld [vmem:[%s280_s1] sm:$0xff] }
   0x4   :  { %v196_v8 = vld [vmem:[%s282_s0] sm:$0xff]  ;;  %v197_v9 = vld [vmem:[%s282_s0 + $0x8] sm:$0xff] }
   0x5   :  { %v214_v10 = vld [vmem:[%s281_s2] ss:$0 sm:$0xff] }
   0x6   :  { %107 = vmatpush.bf16.msra.mxu0 %v204_v1  ;;  %207 = vmatpush.bf16.msra.mxu1 %v204_v1 }
   0xa   :  { %108 = vmatpush.bf16.msra.mxu0 %v203_v2  ;;  %208 = vmatpush.bf16.msra.mxu1 %v203_v2 }
   0xe   :  { %109 = vmatpush.bf16.msra.mxu0 %v202_v3  ;;  %209 = vmatpush.bf16.msra.mxu1 %v202_v3 }
  0x12   :  { %110 = vmatpush.bf16.msra.mxu0 %v201_v4  ;;  %210 = vmatpush.bf16.msra.mxu1 %v201_v4 }
  0x16   :  { %111 = vmatpush.bf16.msra.mxu0 %v200_v5  ;;  %211 = vmatpush.bf16.msra.mxu1 %v200_v5 }
  0x1a   :  { %112 = vmatpush.bf16.msra.mxu0 %v199_v6  ;;  %212 = vmatpush.bf16.msra.mxu1 %v199_v6 }
  0x1e   :  { %113 = vmatpush.bf16.msra.mxu0 %v198_v7  ;;  %213 = vmatpush.bf16.msra.mxu1 %v198_v7 }
  0x21   :  { %114 = vmatmul.bf16.vlgmr.msra.gmra.mxu0 %v196_v8  ;;  %119 = vmatmul.bf16.vlgmr.msra.gmra.mxu1 %v197_v9 }
  0x9e   :  { %v115_v11 = vpop.f32.mrf.mxu0  ;;  %v120_v12 = vpop.f32.mrf.mxu1 }
  0x9f   :  { %v144_v13 = vadd.f32 %v214_v10, %v115_v11  ;;  %v146_v14 = vadd.f32 %v214_v10, %v120_v12 }
  0xa1   :  { %148 = vst [vmem:[%s283_s3] sm:$0xff] %v144_v13 }
  0xa2   :  { %150 = vst [vmem:[%s283_s3 + $0x10] sm:$0xff] %v146_v14 }
  0xa6   :  { %v117_v15 = vpop.f32.mrf.mxu0  ;;  %v122_v16 = vpop.f32.mrf.mxu1 }
  0xa7   :  { %v145_v17 = vadd.f32 %v214_v10, %v117_v15  ;;  %v147_v18 = vadd.f32 %v214_v10, %v122_v16 }
  0xa9   :  { %149 = vst [vmem:[%s283_s3 + $0x8] sm:$0xff] %v145_v17 }
  0xaa   :  { %151 = vst [vmem:[%s283_s3 + $0x18] sm:$0xff] %v147_v18 }

// kernel: vit_forward.13
= control target key start
LH: loop header
LB: loop body
LE: loop exit
PB: predicated region body
PF: predicated region fallthrough
CT: control target
= control target key end

     0   :  { %s595_s0 = inlined_call_operand.vmem [shape: f32[48,128], index: 0, kind: input, shape index: {}]   ;;  %s596_s3 = inlined_call_operand.vmem [shape: f32[1,128], index: 3, kind: input, shape index: {}]   ;;  %s597_s4 = inlined_call_operand.vmem [shape: f32[1,128], index: 4, kind: input, shape index: {}]   ;;  %s598_s2 = inlined_call_operand.vmem [shape: f32[1,128], index: 2, kind: input, shape index: {}]   ;;  %s599_s1 = inlined_call_operand.vmem [shape: bf16[128,128], index: 1, kind: input, shape index: {}]   ;;  %s600_s5 = inlined_call_operand.vmem [shape: bf16[48,128], index: 5, kind: output, shape index: {}]  }
   0x1   :  { %v453_v0 = vld [vmem:[%s595_s0 + $0x20] sm:$0xff]  ;;  %v467_v3 = vld [vmem:[%s595_s0 + $0x28] sm:$0xff]  ;;  %v483_v7 = vld [vmem:[%s595_s0 + $0x10] sm:$0xff] }
   0x2   :  { %v458_v1 = vld [vmem:[%s595_s0] sm:$0xff]  ;;  %44 = vadd.xlane.f32.xlu0 %v453_v0  ;;  %v52_v2 = vmul.f32 %v453_v0, %v453_v0  ;;  %v472_v4 = vld [vmem:[%s595_s0 + $0x8] sm:$0xff]  ;;  %v53_v5 = vmul.f32 %v467_v3, %v467_v3  ;;  %v488_v8 = vld [vmem:[%s595_s0 + $0x18] sm:$0xff]  ;;  %v50_v11 = vmul.f32 %v483_v7, %v483_v7 }
   0x3   :  { %36 = vadd.xlane.f32.xlu2 %v458_v1  ;;  %v48_v6 = vmul.f32 %v458_v1, %v458_v1  ;;  %v49_v9 = vmul.f32 %v472_v4, %v472_v4  ;;  %v51_v10 = vmul.f32 %v488_v8, %v488_v8  ;;  %v371_v12 = vld [vmem:[%s599_s1 + $0x38] sm:$0xff]  ;;  %v370_v13 = vld [vmem:[%s599_s1 + $0x30] sm:$0xff]  ;;  %v369_v14 = vld [vmem:[%s599_s1 + $0x28] sm:$0xff] }
   0x4   :  { %62 = vadd.xlane.f32.xlu1 %v52_v2  ;;  %390 = vmatpush.bf16.msra.mxu2 %v371_v12  ;;  %v368_v15 = vld [vmem:[%s599_s1 + $0x20] sm:$0xff]  ;;  %v367_v16 = vld [vmem:[%s599_s1 + $0x18] sm:$0xff]  ;;  %v366_v17 = vld [vmem:[%s599_s1 + $0x10] sm:$0xff] }
   0x5   :  { %261 = vmatpush.bf16.msra.mxu0 %v371_v12  ;;  %389 = vmatpush.bf16.msra.mxu1 %v371_v12  ;;  %v365_v23 = vld [vmem:[%s599_s1 + $0x8] sm:$0xff]  ;;  %v364_v26 = vld [vmem:[%s599_s1] sm:$0xff] }
   0x8   :  { %392 = vmatpush.bf16.msra.mxu2 %v370_v13 }
   0x9   :  { %262 = vmatpush.bf16.msra.mxu0 %v370_v13  ;;  %391 = vmatpush.bf16.msra.mxu1 %v370_v13 }
   0xa   :  { %46 = vadd.xlane.f32.xlu0 %v467_v3 }
   0xb   :  { %38 = vadd.xlane.f32.xlu2 %v472_v4 }
   0xc   :  { %64 = vadd.xlane.f32.xlu1 %v53_v5  ;;  %394 = vmatpush.bf16.msra.mxu2 %v369_v14 }
   0xd   :  { %263 = vmatpush.bf16.msra.mxu0 %v369_v14  ;;  %393 = vmatpush.bf16.msra.mxu1 %v369_v14 }
  0x10   :  { %396 = vmatpush.bf16.msra.mxu2 %v368_v15 }
  0x11   :  { %264 = vmatpush.bf16.msra.mxu0 %v368_v15  ;;  %395 = vmatpush.bf16.msra.mxu1 %v368_v15 }
  0x12   :  { %40 = vadd.xlane.f32.xlu0 %v483_v7 }
  0x13   :  { %54 = vadd.xlane.f32.xlu2 %v48_v6 }
  0x14   :  { %42 = vadd.xlane.f32.xlu1 %v488_v8  ;;  %398 = vmatpush.bf16.msra.mxu2 %v367_v16 }
  0x15   :  { %265 = vmatpush.bf16.msra.mxu0 %v367_v16  ;;  %397 = vmatpush.bf16.msra.mxu1 %v367_v16 }
  0x18   :  { %400 = vmatpush.bf16.msra.mxu2 %v366_v17 }
  0x19   :  { %266 = vmatpush.bf16.msra.mxu0 %v366_v17  ;;  %399 = vmatpush.bf16.msra.mxu1 %v366_v17 }
  0x1a   :  { %56 = vadd.xlane.f32.xlu0 %v49_v9 }
  0x1b   :  { %60 = vadd.xlane.f32.xlu2 %v51_v10 }
  0x1c   :  { %58 = vadd.xlane.f32.xlu1 %v50_v11  ;;  %402 = vmatpush.bf16.msra.mxu2 %v365_v23 }
  0x1d   :  { %267 = vmatpush.bf16.msra.mxu0 %v365_v23  ;;  %401 = vmatpush.bf16.msra.mxu1 %v365_v23  ;;  %v561_v23 = vld [vmem:[%s596_s3] ss:$0 sm:$0xff] }
  0x20   :  { %404 = vmatpush.bf16.msra.mxu2 %v364_v26 }
  0x21   :  { %268 = vmatpush.bf16.msra.mxu0 %v364_v26  ;;  %403 = vmatpush.bf16.msra.mxu1 %v364_v26 }
  0x75   :  { %v45_v18 = vpop.xlane.xlu0 %44 }
  0x76   :  { %v37_v19 = vpop.xlane.xlu2 %36  ;;  %v516_v20 = vmul.f32 0.03125, %v45_v18 }
  0x77   :  { %v63_v21 = vpop.xlane.xlu1 %62  ;;  %v530_v34 = vmul.f32 0.03125, %v37_v19 }
  0x78   :  { %v82_v22 = vmul.f32 %v516_v20, %v516_v20  ;;  %v76_v24 = vmul.f32 0.03125, %v63_v21  ;;  %v94_v15 = vsub.f32 %v453_v0, %v516_v20 }
  0x79   :  { %v78_v40 = vmul.f32 %v530_v34, %v530_v34 }
  0x7a   :  { %v88_v25 = vsub.f32 %v76_v24, %v82_v22 }
  0x7c   :  { %v100_v27 = vadd.f32 1e-05, %v88_v25 }
  0x7d   :  { %v47_v28 = vpop.xlane.xlu0 %46 }
  0x7e   :  { %v39_v29 = vpop.xlane.xlu2 %38  ;;  %v526_v30 = vmul.f32 0.03125, %v47_v28  ;;  %408 = vrsqrt.f32 %v100_v27  ;;  %vm148_vm1 = vweird.f32 %v100_v27 }
  0x7f   :  { %v65_v31 = vpop.xlane.xlu1 %64  ;;  %v534_v46 = vmul.f32 0.03125, %v39_v29  ;;  %v406_v29 = vld [vmem:[%s597_s4] ss:$0 sm:$0xff] }
  0x80   :  { %v83_v32 = vmul.f32 %v526_v30, %v526_v30  ;;  %v77_v33 = vmul.f32 0.03125, %v65_v31  ;;  %v95_v0 = vsub.f32 %v467_v3, %v526_v30 }
  0x81   :  { %v79_v53 = vmul.f32 %v534_v46, %v534_v46 }
  0x82   :  { %v89_v35 = vsub.f32 %v77_v33, %v83_v32 }
  0x84   :  { %v409_v36 = vpop.eup %408  ;;  %v101_v37 = vadd.f32 1e-05, %v89_v35 }
  0x85   :  { %v41_v38 = vpop.xlane.xlu0 %40  ;;  %v143_v41 = vmul.f32 %v409_v36, %v100_v27  ;;  %vm149_vm0 = vweird.f32 %v409_v36 }
  0x86   :  { %v55_v39 = vpop.xlane.xlu2 %54  ;;  %410 = vrsqrt.f32 %v101_v37  ;;  %v540_v51 = vmul.f32 0.03125, %v41_v38  ;;  %vm549_vm2 = vmor %vm148_vm1, %vm149_vm0  ;;  %vm158_vm4 = vweird.f32 %v101_v37 }
  0x87   :  { %v72_v42 = vmul.f32 0.03125, %v55_v39  ;;  %v43_v43 = vpop.xlane.xlu1 %42  ;;  %v144_v44 = vmul.f32 %v409_v36, %v143_v41 }
  0x88   :  { %v538_v49 = vmul.f32 0.03125, %v43_v43  ;;  %v80_v63 = vmul.f32 %v540_v51, %v540_v51 }
  0x89   :  { %v84_v45 = vsub.f32 %v72_v42, %v78_v40  ;;  %v145_v47 = vmul.f32 0.5, %v144_v44 }
  0x8a   :  { %v81_v59 = vmul.f32 %v538_v49, %v538_v49 }
  0x8b   :  { %v536_v48 = vadd.f32 1e-05, %v84_v45  ;;  %v146_v50 = vsub.f32 1.5, %v145_v47  ;;  %v90_v47 = vsub.f32 %v458_v1, %v530_v34  ;;  %v93_v1 = vsub.f32 %v488_v8, %v538_v49 }
  0x8c   :  { %v411_v52 = vpop.eup %410 }
  0x8d   :  { %412 = vrsqrt.f32 %v536_v48  ;;  %v57_v54 = vpop.xlane.xlu0 %56  ;;  %v147_v56 = vmul.f32 %v409_v36, %v146_v50  ;;  %v153_v57 = vmul.f32 %v411_v52, %v101_v37  ;;  %vm159_vm3 = vweird.f32 %v411_v52 }
  0x8e   :  { %v61_v55 = vpop.xlane.xlu2 %60  ;;  %v73_v58 = vmul.f32 0.03125, %v57_v54  ;;  %vm160_vm5 = vmor %vm158_vm4, %vm159_vm3  ;;  %vm108_vm7 = vweird.f32 %v536_v48 }
  0x8f   :  { %v75_v60 = vmul.f32 0.03125, %v61_v55  ;;  %v59_v61 = vpop.xlane.xlu1 %58  ;;  %v154_v62 = vmul.f32 %v411_v52, %v153_v57  ;;  %v151_v14 = vsel %vm549_vm2, %v409_v36, %v147_v56  ;;  %v91_v57 = vsub.f32 %v472_v4, %v534_v46 }
  0x90   :  { %v85_v2 = vsub.f32 %v73_v58, %v79_v53  ;;  %v74_v5 = vmul.f32 0.03125, %v59_v61  ;;  %v166_v22 = vmul.f32 %v151_v14, %v94_v15 }
  0x91   :  { %v87_v9 = vsub.f32 %v75_v60, %v81_v59  ;;  %v155_v11 = vmul.f32 0.5, %v154_v62  ;;  %v92_v60 = vsub.f32 %v483_v7, %v540_v51 }
  0x92   :  { %v97_v12 = vadd.f32 1e-05, %v85_v2  ;;  %v86_v13 = vsub.f32 %v74_v5, %v80_v63  ;;  %v176_v28 = vmul.f32 %v561_v23, %v166_v22 }
  0x93   :  { %v413_v10 = vpop.eup %412  ;;  %v99_v17 = vadd.f32 1e-05, %v87_v9  ;;  %v156_v18 = vsub.f32 1.5, %v155_v11 }
  0x94   :  { %v103_v16 = vmul.f32 %v413_v10, %v536_v48  ;;  %414 = vrsqrt.f32 %v97_v12  ;;  %v98_v19 = vadd.f32 1e-05, %v86_v13  ;;  %vm109_vm6 = vweird.f32 %v413_v10  ;;  %v407_v13 = vld [vmem:[%s598_s2] ss:$0 sm:$0xff] }
  0x95   :  { %416 = vrsqrt.f32 %v99_v17  ;;  %v157_v24 = vmul.f32 %v411_v52, %v156_v18  ;;  %v186_v39 = vadd.f32 %v406_v29, %v176_v28  ;;  %vm110_vm8 = vmor %vm108_vm7, %vm109_vm6  ;;  %vm118_vm11 = vweird.f32 %v97_v12 }
  0x96   :  { %v104_v21 = vmul.f32 %v413_v10, %v103_v16  ;;  %418 = vrsqrt.f32 %v98_v19  ;;  %vm138_vm14 = vweird.f32 %v99_v17  ;;  %vm128_vm0 = vweird.f32 %v98_v19 }
  0x97   :  { %v161_v25 = vsel %vm160_vm5, %v411_v52, %v157_v24 }
  0x98   :  { %v105_v20 = vmul.f32 0.5, %v104_v21  ;;  %v167_v27 = vmul.f32 %v161_v25, %v95_v0 }
  0x9a   :  { %v106_v26 = vsub.f32 1.5, %v105_v20  ;;  %v415_v31 = vpop.eup %414  ;;  %v177_v36 = vmul.f32 %v561_v23, %v167_v27 }
  0x9b   :  { %v417_v32 = vpop.eup %416  ;;  %v113_v35 = vmul.f32 %v415_v31, %v97_v12  ;;  %vm119_vm9 = vweird.f32 %v415_v31 }
  0x9c   :  { %v107_v33 = vmul.f32 %v413_v10, %v106_v26  ;;  %v419_v37 = vpop.eup %418  ;;  %v133_v3 = vmul.f32 %v417_v32, %v99_v17  ;;  %v187_v40 = vadd.f32 %v406_v29, %v177_v36  ;;  %vm139_vm10 = vweird.f32 %v417_v32  ;;  %vm120_vm13 = vmor %vm118_vm11, %vm119_vm9 }
  0x9d   :  { %v114_v30 = vmul.f32 %v415_v31, %v113_v35  ;;  %v123_v38 = vmul.f32 %v419_v37, %v98_v19  ;;  %vm129_vm12 = vweird.f32 %v419_v37  ;;  %vm140_vm15 = vmor %vm138_vm14, %vm139_vm10 }
  0x9e   :  { %v134_v41 = vmul.f32 %v417_v32, %v133_v3  ;;  %v190_v44 = vpack.c.bf16 %v187_v40, %v186_v39  ;;  %v111_v45 = vsel %vm110_vm8, %v413_v10, %v107_v33  ;;  %vm130_vm1 = vmor %vm128_vm0, %vm129_vm12 }
  0x9f   :  { %v115_v42 = vmul.f32 0.5, %v114_v30  ;;  %v124_v43 = vmul.f32 %v419_v37, %v123_v38  ;;  %v162_v54 = vmul.f32 %v111_v45, %v90_v47 }
  0xa0   :  { %v135_v50 = vmul.f32 0.5, %v134_v41  ;;  %279 = vmatmul.bf16.vlgmr.msra.gmra.mxu2 %v190_v44 }
  0xa1   :  { %v116_v52 = vsub.f32 1.5, %v115_v42  ;;  %v125_v53 = vmul.f32 0.5, %v124_v43  ;;  %v172_v62 = vmul.f32 %v561_v23, %v162_v54 }
  0xa2   :  { %v136_v48 = vsub.f32 1.5, %v135_v50 }
  0xa3   :  { %v117_v55 = vmul.f32 %v415_v31, %v116_v52  ;;  %v126_v56 = vsub.f32 1.5, %v125_v53  ;;  %v182_v8 = vadd.f32 %v406_v29, %v172_v62 }
  0xa4   :  { %v137_v58 = vmul.f32 %v417_v32, %v136_v48 }
  0xa5   :  { %v127_v34 = vmul.f32 %v419_v37, %v126_v56  ;;  %v121_v59 = vsel %vm120_vm13, %v415_v31, %v117_v55 }
  0xa6   :  { %v163_v61 = vmul.f32 %v121_v59, %v91_v57  ;;  %v141_v63 = vsel %vm140_vm15, %v417_v32, %v137_v58 }
  0xa7   :  { %v131_v2 = vsel %vm130_vm1, %v419_v37, %v127_v34  ;;  %v165_v4 = vmul.f32 %v141_v63, %v93_v1 }
  0xa8   :  { %v173_v46 = vmul.f32 %v561_v23, %v163_v61  ;;  %v164_v5 = vmul.f32 %v131_v2, %v92_v60 }
  0xa9   :  { %v175_v6 = vmul.f32 %v561_v23, %v165_v4 }
  0xaa   :  { %v183_v49 = vadd.f32 %v406_v29, %v173_v46  ;;  %v174_v9 = vmul.f32 %v561_v23, %v164_v5 }
  0xab   :  { %v185_v12 = vadd.f32 %v406_v29, %v175_v6 }
  0xac   :  { %v188_v10 = vpack.c.bf16 %v183_v49, %v182_v8  ;;  %v184_v11 = vadd.f32 %v406_v29, %v174_v9 }
  0xae   :  { %269 = vmatmul.bf16.vlgmr.msra.gmra.mxu0 %v188_v10  ;;  %v189_v7 = vpack.c.bf16 %v185_v12, %v184_v11 }
  0xb0   :  { %274 = vmatmul.bf16.vlgmr.msra.gmra.mxu1 %v189_v7 }
 0x123   :  { %v280_v51 = vpop.f32.mrf.mxu2 }
 0x124   :  { %v314_v16 = vadd.f32 %v407_v13, %v280_v51 }
 0x12b   :  { %v270_v14 = vpop.f32.mrf.mxu0  ;;  %v282_v15 = vpop.f32.mrf.mxu2 }
 0x12c   :  { %v315_v17 = vadd.f32 %v407_v13, %v282_v15  ;;  %v310_v22 = vadd.f32 %v407_v13, %v270_v14 }
 0x12d   :  { %v275_v18 = vpop.f32.mrf.mxu1 }
 0x12e   :  { %v385_v19 = vpack.c.bf16 %v315_v17, %v314_v16  ;;  %v312_v0 = vadd.f32 %v407_v13, %v275_v18 }
 0x130   :  { %388 = vst [vmem:[%s600_s5 + $0x10] sm:$0xff] %v385_v19  }
 0x133   :  { %v272_v21 = vpop.f32.mrf.mxu0 }
 0x134   :  { %v311_v23 = vadd.f32 %v407_v13, %v272_v21 }
 0x135   :  { %v277_v24 = vpop.f32.mrf.mxu1 }
 0x136   :  { %v375_v20 = vpack.c.bf16 %v311_v23, %v310_v22  ;;  %v313_v25 = vadd.f32 %v407_v13, %v277_v24 }
 0x138   :  { %376 = vst [vmem:[%s600_s5] sm:$0xff] %v375_v20   ;;  %v380_v26 = vpack.c.bf16 %v313_v25, %v312_v0 }
 0x13a   :  { %387 = vst [vmem:[%s600_s5 + $0x8] sm:$0xff] %v380_v26  }

// kernel: vit_forward.14
= control target key start
LH: loop header
LB: loop body
LE: loop exit
PB: predicated region body
PF: predicated region fallthrough
CT: control target
= control target key end

     0   :  { %s819_s6 = smov 0   ;;  %s1004_s0 = inlined_call_operand.vmem [shape: bf16[2,24,96], index: 0, kind: input, shape index: {}]   ;;  %s1005_s1 = inlined_call_operand.vmem [shape: bf16[2,24,32], index: 1, kind: output, shape index: {}]  }
   0x1 LB: > { %s671_s7 = sadd.s32 4294967295, %s793_s6   ;;  %p675_p0 = scmp.ge.s32.totalorder %s793_s6, 1  ;;  %s793_s6 = sphi %s819_s6, %s11_s6  }
   0x2   : > { %p87_p1 = scmp.lt.s32.totalorder %s793_s6, 3 }
   0x4   : > { %p88_p2 = pnand %p675_p0, %p87_p1 }
   0x5   : > { %p107_p3 = scmp.lt.s32.totalorder (!%p88_p2), %s671_s7, 1  ;;  %s795_s12 = smov (!%p88_p2), 96  }
   0x6   : > { %91 = sbr.rel (%p88_p2) target bundleno = 1402 (0x57a), region = 24  ;;  %s796_s13 = smov (!%p88_p2), 88  }
   0x7   : > { %s797_s14 = smov (!%p88_p2), 120   ;;  %s798_s15 = smov (!%p88_p2), 64  }
   0x8   : > { %s799_s16 = smov (!%p88_p2), 80   ;;  %s800_s17 = smov (!%p88_p2), 72  }
   0x9   : > { %s801_s18 = smov (!%p88_p2), 104   ;;  %s802_s19 = smov (!%p88_p2), 112  }
   0xa   : > { %s803_s20 = smov (!%p88_p2), 56   ;;  %s804_s21 = smov (!%p88_p2), 48  }
   0xb   : > { %s1007_s7 = smov (!%p107_p3, %s671_s7), 1  ;;  %vm136_vm0 = vcmask 64512   ;;  %v121_v10 = vlaneseq  ;;  %vm170_vm2 = vcmask 195584   ;;  %vm217_vm3 = vcmask 1043456   ;;  %s805_s22 = smov 40  }
   0xc   : > { %s701_s8 = smul.u32 12, %s1007_s7  ;;  %s806_s23 = smov 8   ;;  %vm602_vm4 = vcmask 130048   ;;  %vm612_vm5 = vcmask 257024  }
   0xd   : > { %v852_v12 = vand.u32 127, %v121_v10  ;;  %s807_s24 = smov 24   ;;  %s808_s25 = smov 16  }
   0xe   : > { %s111_s11 = scalar_lea.vmem %s1004_s0, %s701_s8  ;;  %s116_s28 = scalar_lea.vmem %s1005_s1, %s701_s8 }
   0xf   : > { %v120_v0 = vld [vmem:[%s111_s11 + $0x8] sm:$0xf]  ;;  %v838_v3 = vld [vmem:[%s111_s11] sm:$0xff]  ;;  %vm123_vm1 = vcmp.lt.s32.totalorder %v852_v12, 17 }
  0x10   : > { %v129_v1 = vunpack.c.l.b16 %v120_v0 }
  0x12   : > { %v835_v2 = vpack.c.b16 %v129_v1, %v129_v1 }
  0x14   : > { %134 = vrot.lane.b32.xlu0 %v835_v2, %s795_s12  ;;  %245 = vrot.lane.b32.xlu2 %v835_v2, %s796_s13 }
  0x1c   : > { %132 = vrot.lane.b32.xlu0 %v838_v3, %s795_s12  ;;  %239 = vrot.lane.b32.xlu2 %v838_v3, %s797_s14 }
  0x24   : > { %243 = vrot.lane.b32.xlu0 %v838_v3, %s796_s13 }
  0x6e   : > { %v246_v8 = vpop.permute.xlu2 %245 }
  0x6f   : > { %v257_v9 = vsel %vm136_vm0, %v246_v8, 0 }
  0x70   : > { %265 = vmatpush.bf16.xpose.msra.mxu2 %v257_v9 }
  0x76   : > { %v240_v16 = vpop.permute.xlu2 %239 }
  0x86   : > { %v135_v4 = vpop.permute.xlu0 %134 }
  0x87   : > { %v147_v5 = vsel %vm136_vm0, %v135_v4, 0 }
  0x88   : > { %155 = vmatpush.bf16.xpose.msra.mxu0 %v147_v5 }
  0x8e   : > { %v133_v6 = vpop.permute.xlu0 %132 }
  0x8f   : > { %v144_v7 = vsel %vm136_vm0, %v133_v6, 0 }
  0x90   : > { %156 = vmatpush.bf16.xpose.msra.mxu0 %v144_v7 }
  0x96   : > { %v244_v11 = vpop.permute.xlu0 %243 }
  0x97   : > { %682 = vmatmul.msk.bf16.vlgmr.msra.gmra.mxu0 %vm136_vm0, %v838_v3  ;;  %v254_v13 = vsel %vm136_vm0, %v244_v11, 0 }
  0x98   : > { %266 = vmatpush.bf16.xpose.msra.mxu2 %v254_v13 }
  0x9f   : > { %686 = vmatmul.msk.bf16.vlgmr.msra.gmra.mxu2 %vm136_vm0, %v240_v16 }
  0xa7   : > { %683 = vmatmul.msk.bf16.gmra.mxu0 %vm136_vm0, %v835_v2 }
 0x114   : > { %v158_v14 = vpop.f32.mrf.mxu0 }
 0x115   : > { %v167_v15 = vsel %vm123_vm1, %v158_v14, -1e+30 }
 0x116   : > { %v171_v17 = vsel %vm170_vm2, %v167_v15, -inf }
 0x117   : > { %172 = vmax.xlane.f32.xlu1 %v171_v17 }
 0x11c   : > { %v160_v18 = vpop.f32.mrf.mxu0 }
 0x11d   : > { %v168_v19 = vsel %vm123_vm1, %v160_v18, -1e+30 }
 0x11e   : > { %v174_v20 = vsel %vm170_vm2, %v168_v19, -inf }
 0x11f   : > { %175 = vmax.xlane.f32.xlu1 %v174_v20 }
 0x122   : > { %v268_v42 = vpop.f32.mrf.mxu2 }
 0x123   : > { %v884_v43 = vsel %vm123_vm1, %v268_v42, -1e+30 }
 0x124   : > { %v163_v21 = vpop.f32.mrf.mxu0  ;;  %v280_v44 = vsel %vm170_vm2, %v884_v43, -inf }
 0x125   : > { %v169_v22 = vsel %vm123_vm1, %v163_v21, -1e+30 }
 0x126   : > { %v177_v23 = vsel %vm170_vm2, %v169_v22, -inf }
 0x127   : > { %178 = vmax.xlane.f32.xlu2 %v177_v23 }
 0x12a   : > { %v270_v46 = vpop.f32.mrf.mxu2 }
 0x12b   : > { %v278_v47 = vsel %vm123_vm1, %v270_v46, -1e+30 }
 0x12c   : > { %v165_v24 = vpop.f32.mrf.mxu0  ;;  %v283_v48 = vsel %vm170_vm2, %v278_v47, -inf }
 0x138   : > { %208 = vrot.lane.b32.xlu1 %v835_v2, %s798_s15 }
 0x13f   : > { %206 = vrot.lane.b32.xlu2 %v838_v3, %s798_s15 }
 0x18a   : > { %v173_v25 = vpop.xlane.xlu1 %172 }
 0x18b   : > { %v180_v26 = vsub.f32 %v167_v15, %v173_v25 }
 0x18d   : > { %v183_v27 = vmul.f32 1.442695, %v180_v26 }
 0x18f   : > { %739 = vpow2.f32 %v183_v27 }
 0x192   : > { %v176_v28 = vpop.xlane.xlu1 %175 }
 0x193   : > { %v181_v29 = vsub.f32 %v168_v19, %v176_v28 }
 0x195   : > { %v740_v30 = vpop.eup %739  ;;  %v185_v31 = vmul.f32 1.442695, %v181_v29 }
 0x196   : > { %v189_v32 = vsel %vm170_vm2, %v740_v30, 0.0 }
 0x197   : > { %741 = vpow2.f32 %v185_v31  ;;  %190 = vadd.xlane.f32.xlu1 %v189_v32 }
 0x19a   : > { %v179_v33 = vpop.xlane.xlu2 %178 }
 0x19b   : > { %v182_v34 = vsub.f32 %v169_v22, %v179_v33 }
 0x19d   : > { %v742_v35 = vpop.eup %741  ;;  %v187_v36 = vmul.f32 1.442695, %v182_v34 }
 0x19e   : > { %v192_v37 = vsel %vm170_vm2, %v742_v35, 0.0 }
 0x19f   : > { %743 = vpow2.f32 %v187_v36  ;;  %193 = vadd.xlane.f32.xlu0 %v192_v37 }
 0x1a2   : > { %v207_v45 = vpop.permute.xlu2 %206 }
 0x1a5   : > { %v744_v38 = vpop.eup %743 }
 0x1a6   : > { %v195_v39 = vsel %vm170_vm2, %v744_v38, 0.0 }
 0x1a7   : > { %196 = vadd.xlane.f32.xlu2 %v195_v39 }
 0x1aa   : > { %v209_v40 = vpop.permute.xlu1 %208 }
 0x1ab   : > { %v219_v41 = vsel %vm217_vm3, %v209_v40, 0 }
 0x1ac   : > { %227 = vmatpush.bf16.msra.mxu1 %v219_v41 }
 0x1b0   : > { %353 = vrot.lane.b32.xlu1 %v835_v2, %s799_s16  ;;  %228 = vmatpush.bf16.msra.mxu1 %v207_v45 }
 0x1b3   : > { %351 = vrot.lane.b32.xlu0 %v838_v3, %s799_s16 }
 0x1b8   : > { %461 = vrot.lane.b32.xlu1 %v835_v2, %s800_s17 }
 0x1bb   : > { %455 = vrot.lane.b32.xlu0 %v838_v3, %s801_s18 }
 0x1bf   : > { %457 = vrot.lane.b32.xlu2 %v835_v2, %s801_s18 }
 0x1c0   : > { %241 = vrot.lane.b32.xlu1 %v835_v2, %s797_s14 }
 0x1c8   : > { %459 = vrot.lane.b32.xlu1 %v838_v3, %s800_s17 }
 0x1d0   : > { %347 = vrot.lane.b32.xlu1 %v838_v3, %s802_s19 }
 0x1d8   : > { %349 = vrot.lane.b32.xlu1 %v835_v2, %s802_s19 }
 0x1e5   : > { %281 = vmax.xlane.f32.xlu0 %v280_v44 }
 0x202   : > { %284 = vmax.xlane.f32.xlu1 %v283_v48 }
 0x20a   : > { %v191_v49 = vpop.xlane.xlu1 %190 }
 0x20b   : > { %745 = vrcp.f32 %v191_v49 }
 0x211   : > { %v746_v51 = vpop.eup %745 }
 0x212   : > { %v194_v50 = vpop.xlane.xlu0 %193  ;;  %v201_v53 = vmul.f32 %v746_v51, %v740_v30 }
 0x213   : > { %747 = vrcp.f32 %v194_v50 }
 0x219   : > { %v748_v52 = vpop.eup %747 }
 0x21a   : > { %v202_v54 = vmul.f32 %v748_v52, %v742_v35  ;;  %v197_v55 = vpop.xlane.xlu2 %196 }
 0x21b   : > { %749 = vrcp.f32 %v197_v55 }
 0x21c   : > { %v204_v56 = vpack.c.bf16 %v202_v54, %v201_v53 }
 0x21e   : > { %684 = vmatmul.msk.bf16.vlgmr.msra.gmra.mxu1 %vm170_vm2, %v204_v56 }
 0x221   : > { %v750_v59 = vpop.eup %749 }
 0x222   : > { %v354_v57 = vpop.permute.xlu1 %353  ;;  %v203_v60 = vmul.f32 %v750_v59, %v744_v38  ;;  %v458_v9 = vpop.permute.xlu2 %457 }
 0x223   : > { %v365_v58 = vsel %vm136_vm0, %v354_v57, 0 }
 0x224   : > { %373 = vmatpush.bf16.xpose.msrb.mxu1 %v365_v58  ;;  %v205_v1 = vpack.c.bf16 %v203_v60, %v203_v60 }
 0x225   : > { %v352_v61 = vpop.permute.xlu0 %351 }
 0x226   : > { %v362_v62 = vsel %vm136_vm0, %v352_v61, 0 }
 0x22a   : > { %v462_v63 = vpop.permute.xlu1 %461 }
 0x22b   : > { %v473_v0 = vsel %vm136_vm0, %v462_v63, 0 }
 0x22c   : > { %481 = vmatpush.bf16.xpose.msrb.mxu0 %v473_v0  ;;  %374 = vmatpush.bf16.xpose.msrb.mxu1 %v362_v62 }
 0x22d   : > { %v456_v7 = vpop.permute.xlu0 %455 }
 0x22e   : > { %685 = vmatmul.msk.bf16.gmra.mxu1 %vm170_vm2, %v205_v1 }
 0x232   : > { %v242_v4 = vpop.permute.xlu1 %241 }
 0x233   : > { %687 = vmatmul.msk.bf16.gmra.mxu2 %vm136_vm0, %v242_v4 }
 0x23a   : > { %v460_v5 = vpop.permute.xlu1 %459 }
 0x23b   : > { %v470_v6 = vsel %vm136_vm0, %v460_v5, 0 }
 0x23c   : > { %482 = vmatpush.bf16.xpose.msrb.mxu0 %v470_v6 }
 0x242   : > { %v348_v8 = vpop.permute.xlu1 %347 }
 0x243   : > { %694 = vmatmul.msk.bf16.vlgmr.msrb.gmra.mxu0 %vm136_vm0, %v456_v7  ;;  %690 = vmatmul.msk.bf16.vlgmr.msrb.gmra.mxu1 %vm136_vm0, %v348_v8 }
 0x24a   : > { %v350_v10 = vpop.permute.xlu1 %349 }
 0x253   : > { %695 = vmatmul.msk.bf16.gmra.mxu0 %vm136_vm0, %v458_v9  ;;  %691 = vmatmul.msk.bf16.gmra.mxu1 %vm136_vm0, %v350_v10 }
 0x258   : > { %v282_v23 = vpop.xlane.xlu0 %281 }
 0x259   : > { %v289_v26 = vsub.f32 %v884_v43, %v282_v23 }
 0x25b   : > { %v292_v28 = vmul.f32 1.442695, %v289_v26 }
 0x275   : > { %v285_v16 = vpop.xlane.xlu1 %284 }
 0x276   : > { %v290_v20 = vsub.f32 %v278_v47, %v285_v16 }
 0x278   : > { %v294_v21 = vmul.f32 1.442695, %v290_v20 }
 0x27a   : > { %751 = vpow2.f32 %v294_v21 }
 0x27b   : > { %753 = vpow2.f32 %v292_v28 }
 0x280   : > { %v915_v29 = vpop.eup %751 }
 0x281   : > { %v301_v33 = vsel %vm170_vm2, %v915_v29, 0.0  ;;  %v754_v36 = vpop.eup %753 }
 0x282   : > { %v298_v41 = vsel %vm170_vm2, %v754_v36, 0.0 }
 0x29b   : > { %v902_v11 = vpop.f32.mrf.mxu1 }
 0x2a3   : > { %v904_v13 = vpop.f32.mrf.mxu1 }
 0x2ab   : > { %v906_v14 = vpop.f32.mrf.mxu1 }
 0x2b3   : > { %v237_v15 = vpop.f32.mrf.mxu1 }
 0x2b6   : > { %v273_v17 = vpop.f32.mrf.mxu2 }
 0x2b7   : > { %v279_v18 = vsel %vm123_vm1, %v273_v17, -1e+30 }
 0x2b8   : > { %v286_v19 = vsel %vm170_vm2, %v279_v18, -inf }
 0x2b9   : > { %287 = vmax.xlane.f32.xlu2 %v286_v19 }
 0x2be   : > { %v275_v22 = vpop.f32.mrf.mxu2 }
 0x2c0   : > { %v484_v24 = vpop.f32.mrf.mxu0  ;;  %v376_v32 = vpop.f32.mrf.mxu1 }
 0x2c1   : > { %v493_v25 = vsel %vm123_vm1, %v484_v24, -1e+30  ;;  %v924_v35 = vsel %vm123_vm1, %v376_v32, -1e+30 }
 0x2c2   : > { %v496_v27 = vsel %vm170_vm2, %v493_v25, -inf  ;;  %v388_v38 = vsel %vm170_vm2, %v924_v35, -inf }
 0x2c3   : > { %497 = vmax.xlane.f32.xlu0 %v496_v27 }
 0x2c8   : > { %v486_v30 = vpop.f32.mrf.mxu0  ;;  %v378_v42 = vpop.f32.mrf.mxu1 }
 0x2c9   : > { %v494_v31 = vsel %vm123_vm1, %v486_v30, -1e+30  ;;  %v934_v43 = vsel %vm123_vm1, %v378_v42, -1e+30 }
 0x2ca   : > { %v499_v34 = vsel %vm170_vm2, %v494_v31, -inf  ;;  %v391_v45 = vsel %vm170_vm2, %v934_v43, -inf }
 0x2cb   : > { %302 = vadd.xlane.f32.xlu0 %v301_v33  ;;  %500 = vmax.xlane.f32.xlu1 %v499_v34 }
 0x2d0   : > { %v489_v37 = vpop.f32.mrf.mxu0  ;;  %v381_v61 = vpop.f32.mrf.mxu1 }
 0x2d1   : > { %v495_v39 = vsel %vm123_vm1, %v489_v37, -1e+30  ;;  %v387_v23 = vsel %vm123_vm1, %v381_v61, -1e+30 }
 0x2d2   : > { %v502_v40 = vsel %vm170_vm2, %v495_v39, -inf }
 0x2d3   : > { %389 = vmax.xlane.f32.xlu0 %v388_v38  ;;  %503 = vmax.xlane.f32.xlu2 %v502_v40 }
 0x2d4   : > { %299 = vadd.xlane.f32.xlu1 %v298_v41 }
 0x2d8   : > { %v491_v44 = vpop.f32.mrf.mxu0  ;;  %v383_v5 = vpop.f32.mrf.mxu1 }
 0x2dc   : > { %392 = vmax.xlane.f32.xlu1 %v391_v45 }
 0x2eb   : > { %317 = vrot.lane.b32.xlu2 %v835_v2, %s803_s20 }
 0x2f5   : > { %315 = vrot.lane.b32.xlu1 %v838_v3, %s803_s20 }
 0x32c   : > { %v288_v46 = vpop.xlane.xlu2 %287 }
 0x32d   : > { %v291_v47 = vsub.f32 %v279_v18, %v288_v46 }
 0x32f   : > { %v296_v48 = vmul.f32 1.442695, %v291_v47 }
 0x331   : > { %755 = vpow2.f32 %v296_v48 }
 0x336   : > { %v498_v49 = vpop.xlane.xlu0 %497 }
 0x337   : > { %v940_v50 = vpop.eup %755  ;;  %v505_v51 = vsub.f32 %v493_v25, %v498_v49  ;;  %v394_v25 = vsel %vm170_vm2, %v387_v23, -inf }
 0x338   : > { %v304_v52 = vsel %vm170_vm2, %v940_v50, 0.0 }
 0x339   : > { %v508_v53 = vmul.f32 1.442695, %v505_v51  ;;  %305 = vadd.xlane.f32.xlu0 %v304_v52 }
 0x33b   : > { %757 = vpow2.f32 %v508_v53 }
 0x33e   : > { %v501_v54 = vpop.xlane.xlu1 %500  ;;  %v303_v9 = vpop.xlane.xlu0 %302 }
 0x33f   : > { %v506_v55 = vsub.f32 %v494_v31, %v501_v54 }
 0x341   : > { %v944_v56 = vpop.eup %757  ;;  %v510_v57 = vmul.f32 1.442695, %v506_v55 }
 0x342   : > { %v514_v58 = vsel %vm170_vm2, %v944_v56, 0.0 }
 0x343   : > { %759 = vpow2.f32 %v510_v57  ;;  %515 = vadd.xlane.f32.xlu2 %v514_v58 }
 0x346   : > { %v504_v59 = vpop.xlane.xlu2 %503  ;;  %v390_v21 = vpop.xlane.xlu0 %389 }
 0x347   : > { %v507_v60 = vsub.f32 %v495_v39, %v504_v59  ;;  %v300_v8 = vpop.xlane.xlu1 %299  ;;  %v397_v22 = vsub.f32 %v924_v35, %v390_v21 }
 0x349   : > { %v948_v62 = vpop.eup %759  ;;  %v512_v63 = vmul.f32 1.442695, %v507_v60 }
 0x34a   : > { %v517_v0 = vsel %vm170_vm2, %v948_v62, 0.0 }
 0x34b   : > { %761 = vpow2.f32 %v512_v63  ;;  %518 = vadd.xlane.f32.xlu1 %v517_v0 }
 0x34c   : > { %763 = vrcp.f32 %v300_v8 }
 0x34d   : > { %425 = vrot.lane.b32.xlu0 %v835_v2, %s804_s21  ;;  %765 = vrcp.f32 %v303_v9 }
 0x34e   : > { %v318_v1 = vpop.permute.xlu2 %317 }
 0x34f   : > { %v327_v4 = vsel %vm217_vm3, %v318_v1, 0  ;;  %v393_v10 = vpop.xlane.xlu1 %392 }
 0x350   : > { %335 = vmatpush.bf16.msra.mxu3 %v327_v4  ;;  %v398_v24 = vsub.f32 %v934_v43, %v393_v10 }
 0x351   : > { %v955_v6 = vpop.eup %761 }
 0x352   : > { %v520_v7 = vsel %vm170_vm2, %v955_v6, 0.0  ;;  %v764_v15 = vpop.eup %763  ;;  %v402_v26 = vmul.f32 1.442695, %v398_v24 }
 0x353   : > { %521 = vadd.xlane.f32.xlu1 %v520_v7  ;;  %v766_v16 = vpop.eup %765  ;;  %v310_v17 = vmul.f32 %v764_v15, %v754_v36 }
 0x354   : > { %v311_v19 = vmul.f32 %v766_v16, %v915_v29 }
 0x355   : > { %533 = vrot.lane.b32.xlu0 %v835_v2, %s805_s22  ;;  %v400_v2 = vmul.f32 1.442695, %v397_v22 }
 0x356   : > { %v313_v20 = vpack.c.bf16 %v311_v19, %v310_v17 }
 0x357   : > { %767 = vpow2.f32 %v400_v2 }
 0x358   : > { %769 = vpow2.f32 %v402_v26 }
 0x35b   : > { %531 = vrot.lane.b32.xlu2 %v838_v3, %s805_s22 }
 0x35d   : > { %v768_v27 = vpop.eup %767 }
 0x35e   : > { %v406_v28 = vsel %vm170_vm2, %v768_v27, 0.0  ;;  %v770_v29 = vpop.eup %769 }
 0x35f   : > { %v409_v30 = vsel %vm170_vm2, %v770_v29, 0.0 }
 0x367   : > { %v316_v18 = vpop.permute.xlu1 %315 }
 0x368   : > { %336 = vmatpush.bf16.msra.mxu3 %v316_v18 }
 0x36b   : > { %688 = vmatmul.msk.bf16.vlgmr.msra.gmra.mxu3 %vm170_vm2, %v313_v20 }
 0x37f   : > { %395 = vmax.xlane.f32.xlu0 %v394_v25 }
 0x387   : > { %407 = vadd.xlane.f32.xlu0 %v406_v28 }
 0x38f   : > { %410 = vadd.xlane.f32.xlu0 %v409_v30 }
 0x3a3   : > { %423 = vrot.lane.b32.xlu0 %v838_v3, %s804_s21 }
 0x3ac   : > { %v306_v12 = vpop.xlane.xlu0 %305 }
 0x3ad   : > { %771 = vrcp.f32 %v306_v12 }
 0x3b3   : > { %v772_v31 = vpop.eup %771 }
 0x3b4   : > { %v312_v32 = vmul.f32 %v772_v31, %v940_v50 }
 0x3b6   : > { %v314_v33 = vpack.c.bf16 %v312_v32, %v312_v32  ;;  %v516_v36 = vpop.xlane.xlu2 %515 }
 0x3b8   : > { %689 = vmatmul.msk.bf16.gmra.mxu3 %vm170_vm2, %v314_v33 }
 0x3be   : > { %v519_v34 = vpop.xlane.xlu1 %518  ;;  %v532_v42 = vpop.permute.xlu2 %531 }
 0x3bf   : > { %v426_v35 = vpop.permute.xlu0 %425  ;;  %773 = vrcp.f32 %v519_v34 }
 0x3c0   : > { %v435_v37 = vsel %vm217_vm3, %v426_v35, 0  ;;  %775 = vrcp.f32 %v516_v36 }
 0x3c1   : > { %443 = vmatpush.bf16.msrb.mxu3 %v435_v37 }
 0x3c5   : > { %v774_v38 = vpop.eup %773 }
 0x3c6   : > { %v776_v40 = vpop.eup %775  ;;  %v527_v41 = vmul.f32 %v774_v38, %v948_v62  ;;  %v522_v44 = vpop.xlane.xlu1 %521 }
 0x3c7   : > { %v534_v39 = vpop.permute.xlu0 %533  ;;  %v526_v43 = vmul.f32 %v776_v40, %v944_v56  ;;  %777 = vrcp.f32 %v522_v44 }
 0x3c8   : > { %v543_v3 = vsel %vm217_vm3, %v534_v39, 0 }
 0x3c9   : > { %551 = vmatpush.bf16.msrb.mxu2 %v543_v3  ;;  %v529_v45 = vpack.c.bf16 %v527_v41, %v526_v43 }
 0x3cd   : > { %552 = vmatpush.bf16.msrb.mxu2 %v532_v42  ;;  %v778_v46 = vpop.eup %777 }
 0x3ce   : > { %v528_v47 = vmul.f32 %v778_v46, %v955_v6 }
 0x3d0   : > { %696 = vmatmul.msk.bf16.vlgmr.msrb.gmra.mxu2 %vm170_vm2, %v529_v45  ;;  %v530_v48 = vpack.c.bf16 %v528_v47, %v528_v47 }
 0x3e0   : > { %697 = vmatmul.msk.bf16.gmra.mxu2 %vm170_vm2, %v530_v48 }
 0x3ee   : > { %v338_v49 = vpop.f32.mrf.mxu3 }
 0x3f2   : > { %v396_v50 = vpop.xlane.xlu0 %395 }
 0x3f3   : > { %v399_v51 = vsub.f32 %v387_v23, %v396_v50 }
 0x3f5   : > { %v404_v52 = vmul.f32 1.442695, %v399_v51 }
 0x3f6   : > { %v340_v53 = vpop.f32.mrf.mxu3 }
 0x3f7   : > { %779 = vpow2.f32 %v404_v52  ;;  %v724_v54 = vpack.i.bf16 %v340_v53, %v338_v49 }
 0x3f9   : > { %725 = vrot.lane.b32.xlu1 %v724_v54, %s806_s23 }
 0x3fa   : > { %v408_v56 = vpop.xlane.xlu0 %407 }
 0x3fd   : > { %v780_v55 = vpop.eup %779 }
 0x3fe   : > { %v412_v57 = vsel %vm170_vm2, %v780_v55, 0.0 }
 0x3ff   : > { %413 = vadd.xlane.f32.xlu0 %v412_v57 }
 0x402   : > { %v411_v58 = vpop.xlane.xlu0 %410 }
 0x403   : > { %781 = vrcp.f32 %v411_v58 }
 0x404   : > { %783 = vrcp.f32 %v408_v56 }
 0x409   : > { %v782_v59 = vpop.eup %781 }
 0x40a   : > { %v784_v60 = vpop.eup %783  ;;  %v419_v61 = vmul.f32 %v782_v59, %v770_v29 }
 0x40b   : > { %v418_v62 = vmul.f32 %v784_v60, %v768_v27 }
 0x40d   : > { %v421_v0 = vpack.c.bf16 %v419_v61, %v418_v62 }
 0x415   : > { %v424_v63 = vpop.permute.xlu0 %423 }
 0x416   : > { %444 = vmatpush.bf16.msrb.mxu3 %v424_v63 }
 0x419   : > { %692 = vmatmul.msk.bf16.vlgmr.msrb.gmra.mxu3 %vm170_vm2, %v421_v0 }
 0x43b   : > { %v343_v1 = vpop.f32.mrf.mxu3 }
 0x43c   : > { %570 = vrot.lane.b32.xlu2 %v343_v1, %s806_s23 }
 0x443   : > { %v345_v4 = vpop.f32.mrf.mxu3 }
 0x453   : > { %v554_v5 = vpop.f32.mrf.mxu2 }
 0x45b   : > { %v556_v6 = vpop.f32.mrf.mxu2 }
 0x45c   : > { %v734_v7 = vpack.i.bf16 %v556_v6, %v554_v5 }
 0x463   : > { %v559_v8 = vpop.f32.mrf.mxu2 }
 0x464   : > { %594 = vrot.lane.b32.xlu0 %v559_v8, %s807_s24 }
 0x46b   : > { %v561_v9 = vpop.f32.mrf.mxu2  ;;  %v726_v23 = vpop.permute.xlu1 %725 }
 0x46c   : > { %v728_v24 = vunpack.i.h.bf16 %v726_v23  ;;  %v727_v25 = vunpack.i.l.bf16 %v726_v23 }
 0x46e   : > { %v600_v30 = vsel %vm136_vm0, %v904_v13, %v728_v24  ;;  %v599_v12 = vsel %vm136_vm0, %v902_v11, %v727_v25 }
 0x472   : > { %v414_v10 = vpop.xlane.xlu0 %413 }
 0x473   : > { %785 = vrcp.f32 %v414_v10 }
 0x479   : > { %v786_v15 = vpop.eup %785 }
 0x47a   : > { %v420_v16 = vmul.f32 %v786_v15, %v780_v55 }
 0x47c   : > { %v422_v17 = vpack.c.bf16 %v420_v16, %v420_v16 }
 0x47e   : > { %693 = vmatmul.msk.bf16.gmra.mxu3 %vm170_vm2, %v422_v17 }
 0x496   : > { %v571_v21 = vpop.permute.xlu2 %570 }
 0x497   : > { %v601_v11 = vsel %vm136_vm0, %v906_v14, %v571_v21 }
 0x49c   : > { %v446_v18 = vpop.f32.mrf.mxu3 }
 0x4a4   : > { %v448_v19 = vpop.f32.mrf.mxu3 }
 0x4a5   : > { %v729_v20 = vpack.i.bf16 %v448_v19, %v446_v18 }
 0x4a7   : > { %730 = vrot.lane.b32.xlu2 %v729_v20, %s808_s25 }
 0x4af   : > { %735 = vrot.lane.b32.xlu2 %v734_v7, %s807_s24 }
 0x4d6   : > { %v595_v39 = vpop.permute.xlu0 %594 }
 0x501   : > { %v731_v22 = vpop.permute.xlu2 %730  ;;  %v451_v2 = vpop.f32.mrf.mxu3 }
 0x502   : > { %582 = vrot.lane.b32.xlu1 %v451_v2, %s808_s25  ;;  %v733_v26 = vunpack.i.h.bf16 %v731_v22  ;;  %v732_v27 = vunpack.i.l.bf16 %v731_v22 }
 0x504   : > { %v603_v33 = vsel %vm602_vm4, %v599_v12, %v732_v27  ;;  %v604_v34 = vsel %vm602_vm4, %v600_v30, %v733_v26 }
 0x509   : > { %v736_v28 = vpop.permute.xlu2 %735  ;;  %v453_v29 = vpop.f32.mrf.mxu3 }
 0x50a   : > { %v738_v31 = vunpack.i.h.bf16 %v736_v28  ;;  %v737_v32 = vunpack.i.l.bf16 %v736_v28 }
 0x50c   : > { %v606_v35 = vsel %vm170_vm2, %v603_v33, %v737_v32  ;;  %v607_v36 = vsel %vm170_vm2, %v604_v34, %v738_v31 }
 0x50d   : > { %v609_v13 = vpack.c.bf16 %v606_v35, %v606_v35  ;;  %v610_v37 = vpack.c.bf16 %v607_v36, %v607_v36 }
 0x50f   : > { %613 = vst.msk [vmem:[%s116_s28] sm:$0xf] %vm612_vm5, %v609_v13 }
 0x510   : > { %614 = vst.msk [vmem:[%s116_s28 + $0x4] sm:$0xf] %vm612_vm5, %v610_v37 }
 0x574   : > { %v583_v38 = vpop.permute.xlu1 %582 }
 0x575   : > { %v605_v3 = vsel %vm602_vm4, %v601_v11, %v583_v38 }
 0x576   : > { %v608_v40 = vsel %vm170_vm2, %v605_v3, %v595_v39 }
 0x577   : > { %v611_v41 = vpack.c.bf16 %v608_v40, %v608_v40 }
 0x579   : > { %615 = vst.msk [vmem:[%s116_s28 + $0x8] sm:$0xf] %vm612_vm5, %v611_v41 }
 0x57a PF: > { %s11_s6 = sadd.s32 1, %s793_s6  }
 0x57b   : > { %p8_p4 = scmp.ge.s32.totalorder %s11_s6, 4  }
 0x57d   :  { %10 = sbr.rel (!%p8_p4) target bundleno = 1 (0x1), region = 54 }

// kernel: vit_forward.15
= control target key start
LH: loop header
LB: loop body
LE: loop exit
PB: predicated region body
PF: predicated region fallthrough
CT: control target
= control target key end

     0   :  { %s367_s1 = inlined_call_operand.vmem [shape: bf16[128,128], index: 1, kind: input, shape index: {}]   ;;  %s368_s2 = inlined_call_operand.vmem [shape: f32[1,128], index: 2, kind: input, shape index: {}]   ;;  %s369_s0 = inlined_call_operand.vmem [shape: bf16[48,128], index: 0, kind: input, shape index: {}]   ;;  %s370_s3 = inlined_call_operand.vmem [shape: f32[48,128], index: 3, kind: input, shape index: {}]   ;;  %s371_s4 = inlined_call_operand.vmem [shape: f32[48,128], index: 4, kind: output, shape index: {}]  }
   0x1   :  { %v252_v0 = vld [vmem:[%s367_s1 + $0x38] sm:$0xff]  ;;  %v251_v1 = vld [vmem:[%s367_s1 + $0x30] sm:$0xff]  ;;  %v250_v2 = vld [vmem:[%s367_s1 + $0x28] sm:$0xff] }
   0x2   :  { %121 = vmatpush.bf16.msra.mxu0 %v252_v0  ;;  %253 = vmatpush.bf16.msra.mxu1 %v252_v0  ;;  %v249_v3 = vld [vmem:[%s367_s1 + $0x20] sm:$0xff]  ;;  %v248_v4 = vld [vmem:[%s367_s1 + $0x18] sm:$0xff]  ;;  %v247_v5 = vld [vmem:[%s367_s1 + $0x10] sm:$0xff] }
   0x3   :  { %254 = vmatpush.bf16.msra.mxu2 %v252_v0  ;;  %v246_v6 = vld [vmem:[%s367_s1 + $0x8] sm:$0xff]  ;;  %v245_v7 = vld [vmem:[%s367_s1] sm:$0xff]  ;;  %v244_v10 = vld [vmem:[%s369_s0 + $0x10] sm:$0xff] }
   0x4   :  { %v242_v8 = vld [vmem:[%s369_s0] sm:$0xff]  ;;  %v243_v9 = vld [vmem:[%s369_s0 + $0x8] sm:$0xff]  ;;  %v178_v15 = vld [vmem:[%s370_s3 + $0x10] sm:$0xff] }
   0x5   :  { %v269_v11 = vld [vmem:[%s368_s2] ss:$0 sm:$0xff]  ;;  %v177_v24 = vld [vmem:[%s370_s3 + $0x8] sm:$0xff]  ;;  %v179_v26 = vld [vmem:[%s370_s3 + $0x18] sm:$0xff] }
   0x6   :  { %122 = vmatpush.bf16.msra.mxu0 %v251_v1  ;;  %255 = vmatpush.bf16.msra.mxu1 %v251_v1  ;;  %v176_v13 = vld [vmem:[%s370_s3] sm:$0xff]  ;;  %v181_v33 = vld [vmem:[%s370_s3 + $0x28] sm:$0xff] }
   0x7   :  { %256 = vmatpush.bf16.msra.mxu2 %v251_v1  ;;  %v180_v21 = vld [vmem:[%s370_s3 + $0x20] sm:$0xff] }
   0xa   :  { %123 = vmatpush.bf16.msra.mxu0 %v250_v2  ;;  %257 = vmatpush.bf16.msra.mxu1 %v250_v2 }
   0xb   :  { %258 = vmatpush.bf16.msra.mxu2 %v250_v2 }
   0xe   :  { %124 = vmatpush.bf16.msra.mxu0 %v249_v3  ;;  %259 = vmatpush.bf16.msra.mxu1 %v249_v3 }
   0xf   :  { %260 = vmatpush.bf16.msra.mxu2 %v249_v3 }
  0x12   :  { %125 = vmatpush.bf16.msra.mxu0 %v248_v4  ;;  %261 = vmatpush.bf16.msra.mxu1 %v248_v4 }
  0x13   :  { %262 = vmatpush.bf16.msra.mxu2 %v248_v4 }
  0x16   :  { %126 = vmatpush.bf16.msra.mxu0 %v247_v5  ;;  %263 = vmatpush.bf16.msra.mxu1 %v247_v5 }
  0x17   :  { %264 = vmatpush.bf16.msra.mxu2 %v247_v5 }
  0x1a   :  { %127 = vmatpush.bf16.msra.mxu0 %v246_v6  ;;  %265 = vmatpush.bf16.msra.mxu1 %v246_v6 }
  0x1b   :  { %266 = vmatpush.bf16.msra.mxu2 %v246_v6 }
  0x1e   :  { %128 = vmatpush.bf16.msra.mxu0 %v245_v7  ;;  %267 = vmatpush.bf16.msra.mxu1 %v245_v7 }
  0x1f   :  { %268 = vmatpush.bf16.msra.mxu2 %v245_v7 }
  0x21   :  { %129 = vmatmul.bf16.vlgmr.msra.gmra.mxu0 %v242_v8  ;;  %134 = vmatmul.bf16.vlgmr.msra.gmra.mxu1 %v243_v9 }
  0x22   :  { %139 = vmatmul.bf16.vlgmr.msra.gmra.mxu2 %v244_v10 }
  0x9e   :  { %v130_v12 = vpop.f32.mrf.mxu0  ;;  %v135_v14 = vpop.f32.mrf.mxu1 }
  0x9f   :  { %v170_v16 = vadd.f32 %v269_v11, %v130_v12  ;;  %v172_v17 = vadd.f32 %v269_v11, %v135_v14 }
  0xa1   :  { %v182_v18 = vadd.f32 %v176_v13, %v170_v16  ;;  %v184_v19 = vadd.f32 %v178_v15, %v172_v17 }
  0xa3   :  { %188 = vst [vmem:[%s371_s4] sm:$0xff] %v182_v18 }
  0xa4   :  { %190 = vst [vmem:[%s371_s4 + $0x10] sm:$0xff] %v184_v19 }
  0xa5   :  { %v140_v20 = vpop.f32.mrf.mxu2 }
  0xa6   :  { %v174_v22 = vadd.f32 %v269_v11, %v140_v20  ;;  %v132_v23 = vpop.f32.mrf.mxu0  ;;  %v137_v25 = vpop.f32.mrf.mxu1 }
  0xa7   :  { %v171_v27 = vadd.f32 %v269_v11, %v132_v23  ;;  %v173_v28 = vadd.f32 %v269_v11, %v137_v25 }
  0xa8   :  { %v186_v29 = vadd.f32 %v180_v21, %v174_v22 }
  0xa9   :  { %v183_v30 = vadd.f32 %v177_v24, %v171_v27  ;;  %v185_v31 = vadd.f32 %v179_v26, %v173_v28 }
  0xaa   :  { %192 = vst [vmem:[%s371_s4 + $0x20] sm:$0xff] %v186_v29 }
  0xab   :  { %189 = vst [vmem:[%s371_s4 + $0x8] sm:$0xff] %v183_v30 }
  0xac   :  { %191 = vst [vmem:[%s371_s4 + $0x18] sm:$0xff] %v185_v31 }
  0xad   :  { %v142_v32 = vpop.f32.mrf.mxu2 }
  0xae   :  { %v175_v34 = vadd.f32 %v269_v11, %v142_v32 }
  0xb0   :  { %v187_v35 = vadd.f32 %v181_v33, %v175_v34 }
  0xb2   :  { %193 = vst [vmem:[%s371_s4 + $0x28] sm:$0xff] %v187_v35 }

// kernel: vit_forward.23
= control target key start
LH: loop header
LB: loop body
LE: loop exit
PB: predicated region body
PF: predicated region fallthrough
CT: control target
= control target key end

     0   :  { %s208_s1 = inlined_call_operand.vmem [shape: bf16[128,128], index: 1, kind: input, shape index: {}]   ;;  %s209_s2 = inlined_call_operand.vmem [shape: f32[1,128], index: 2, kind: input, shape index: {}]   ;;  %s210_s0 = inlined_call_operand.vmem [shape: bf16[8,128], index: 0, kind: input, shape index: {}]   ;;  %s211_s3 = inlined_call_operand.vmem [shape: f32[8,128], index: 3, kind: output, shape index: {}]  }
   0x1   :  { %v153_v0 = vld [vmem:[%s208_s1 + $0x38] sm:$0xff]  ;;  %v152_v1 = vld [vmem:[%s208_s1 + $0x30] sm:$0xff]  ;;  %v151_v2 = vld [vmem:[%s208_s1 + $0x28] sm:$0xff] }
   0x2   :  { %85 = vmatpush.bf16.msra.mxu0 %v153_v0  ;;  %v150_v3 = vld [vmem:[%s208_s1 + $0x20] sm:$0xff]  ;;  %v149_v4 = vld [vmem:[%s208_s1 + $0x18] sm:$0xff]  ;;  %v148_v5 = vld [vmem:[%s208_s1 + $0x10] sm:$0xff] }
   0x3   :  { %v147_v6 = vld [vmem:[%s208_s1 + $0x8] sm:$0xff]  ;;  %v146_v7 = vld [vmem:[%s208_s1] sm:$0xff] }
   0x4   :  { %v19_v8 = vld [vmem:[%s210_s0] sm:$0xf] }
   0x5   :  { %v154_v9 = vld [vmem:[%s209_s2] ss:$0 sm:$0xff] }
   0x6   :  { %86 = vmatpush.bf16.msra.mxu0 %v152_v1 }
   0xa   :  { %87 = vmatpush.bf16.msra.mxu0 %v151_v2 }
   0xe   :  { %88 = vmatpush.bf16.msra.mxu0 %v150_v3 }
  0x12   :  { %89 = vmatpush.bf16.msra.mxu0 %v149_v4 }
  0x16   :  { %90 = vmatpush.bf16.msra.mxu0 %v148_v5 }
  0x1a   :  { %91 = vmatpush.bf16.msra.mxu0 %v147_v6 }
  0x1e   :  { %92 = vmatpush.bf16.msra.mxu0 %v146_v7 }
  0x21   :  { %93 = vmatmul.bf16.vlgmr.msra.gmra.mxu0 %v19_v8 }
  0x9e   :  { %v94_v10 = vpop.f32.mrf.mxu0 }
  0x9f   :  { %v108_v11 = vadd.f32 %v154_v9, %v94_v10 }
  0xa1   :  { %109 = vst [vmem:[%s211_s3] sm:$0xff] %v108_v11 }
  0xa6   :  { %v96_v12 = vpop.f32.mrf.mxu0 }

// kernel: vit_forward.16
= control target key start
LH: loop header
LB: loop body
LE: loop exit
PB: predicated region body
PF: predicated region fallthrough
CT: control target
= control target key end

     0   :  { %s668_s0 = inlined_call_operand.vmem [shape: f32[48,128], index: 0, kind: input, shape index: {}]   ;;  %s669_s3 = inlined_call_operand.vmem [shape: f32[1,128], index: 3, kind: input, shape index: {}]   ;;  %s670_s4 = inlined_call_operand.vmem [shape: f32[1,128], index: 4, kind: input, shape index: {}]   ;;  %s671_s2 = inlined_call_operand.vmem [shape: f32[1,128], index: 2, kind: input, shape index: {}]   ;;  %s672_s1 = inlined_call_operand.vmem [shape: bf16[128,128], index: 1, kind: input, shape index: {}]   ;;  %s673_s5 = inlined_call_operand.vmem [shape: bf16[48,128], index: 5, kind: output, shape index: {}]  }
   0x1   :  { %v519_v0 = vld [vmem:[%s668_s0 + $0x20] sm:$0xff]  ;;  %v533_v3 = vld [vmem:[%s668_s0 + $0x28] sm:$0xff]  ;;  %v549_v7 = vld [vmem:[%s668_s0 + $0x10] sm:$0xff] }
   0x2   :  { %v524_v1 = vld [vmem:[%s668_s0] sm:$0xff]  ;;  %44 = vadd.xlane.f32.xlu0 %v519_v0  ;;  %v52_v2 = vmul.f32 %v519_v0, %v519_v0  ;;  %v538_v4 = vld [vmem:[%s668_s0 + $0x8] sm:$0xff]  ;;  %v53_v5 = vmul.f32 %v533_v3, %v533_v3  ;;  %v554_v8 = vld [vmem:[%s668_s0 + $0x18] sm:$0xff]  ;;  %v50_v11 = vmul.f32 %v549_v7, %v549_v7 }
   0x3   :  { %36 = vadd.xlane.f32.xlu2 %v524_v1  ;;  %v48_v6 = vmul.f32 %v524_v1, %v524_v1  ;;  %v49_v9 = vmul.f32 %v538_v4, %v538_v4  ;;  %v51_v10 = vmul.f32 %v554_v8, %v554_v8  ;;  %v425_v12 = vld [vmem:[%s672_s1 + $0x38] sm:$0xff]  ;;  %v424_v13 = vld [vmem:[%s672_s1 + $0x30] sm:$0xff]  ;;  %v423_v14 = vld [vmem:[%s672_s1 + $0x28] sm:$0xff] }
   0x4   :  { %62 = vadd.xlane.f32.xlu1 %v52_v2  ;;  %444 = vmatpush.bf16.msra.mxu2 %v425_v12  ;;  %v422_v15 = vld [vmem:[%s672_s1 + $0x20] sm:$0xff]  ;;  %v421_v16 = vld [vmem:[%s672_s1 + $0x18] sm:$0xff]  ;;  %v420_v17 = vld [vmem:[%s672_s1 + $0x10] sm:$0xff] }
   0x5   :  { %261 = vmatpush.bf16.msra.mxu0 %v425_v12  ;;  %443 = vmatpush.bf16.msra.mxu1 %v425_v12  ;;  %v419_v23 = vld [vmem:[%s672_s1 + $0x8] sm:$0xff]  ;;  %v418_v26 = vld [vmem:[%s672_s1] sm:$0xff] }
   0x8   :  { %446 = vmatpush.bf16.msra.mxu2 %v424_v13 }
   0x9   :  { %262 = vmatpush.bf16.msra.mxu0 %v424_v13  ;;  %445 = vmatpush.bf16.msra.mxu1 %v424_v13 }
   0xa   :  { %46 = vadd.xlane.f32.xlu0 %v533_v3 }
   0xb   :  { %38 = vadd.xlane.f32.xlu2 %v538_v4 }
   0xc   :  { %64 = vadd.xlane.f32.xlu1 %v53_v5  ;;  %448 = vmatpush.bf16.msra.mxu2 %v423_v14 }
   0xd   :  { %263 = vmatpush.bf16.msra.mxu0 %v423_v14  ;;  %447 = vmatpush.bf16.msra.mxu1 %v423_v14 }
  0x10   :  { %450 = vmatpush.bf16.msra.mxu2 %v422_v15 }
  0x11   :  { %264 = vmatpush.bf16.msra.mxu0 %v422_v15  ;;  %449 = vmatpush.bf16.msra.mxu1 %v422_v15 }
  0x12   :  { %40 = vadd.xlane.f32.xlu0 %v549_v7 }
  0x13   :  { %54 = vadd.xlane.f32.xlu2 %v48_v6 }
  0x14   :  { %42 = vadd.xlane.f32.xlu1 %v554_v8  ;;  %452 = vmatpush.bf16.msra.mxu2 %v421_v16 }
  0x15   :  { %265 = vmatpush.bf16.msra.mxu0 %v421_v16  ;;  %451 = vmatpush.bf16.msra.mxu1 %v421_v16 }
  0x18   :  { %454 = vmatpush.bf16.msra.mxu2 %v420_v17 }
  0x19   :  { %266 = vmatpush.bf16.msra.mxu0 %v420_v17  ;;  %453 = vmatpush.bf16.msra.mxu1 %v420_v17 }
  0x1a   :  { %56 = vadd.xlane.f32.xlu0 %v49_v9 }
  0x1b   :  { %60 = vadd.xlane.f32.xlu2 %v51_v10 }
  0x1c   :  { %58 = vadd.xlane.f32.xlu1 %v50_v11  ;;  %456 = vmatpush.bf16.msra.mxu2 %v419_v23 }
  0x1d   :  { %267 = vmatpush.bf16.msra.mxu0 %v419_v23  ;;  %455 = vmatpush.bf16.msra.mxu1 %v419_v23  ;;  %v627_v23 = vld [vmem:[%s669_s3] ss:$0 sm:$0xff] }
  0x20   :  { %458 = vmatpush.bf16.msra.mxu2 %v418_v26 }
  0x21   :  { %268 = vmatpush.bf16.msra.mxu0 %v418_v26  ;;  %457 = vmatpush.bf16.msra.mxu1 %v418_v26 }
  0x75   :  { %v45_v18 = vpop.xlane.xlu0 %44 }
  0x76   :  { %v37_v19 = vpop.xlane.xlu2 %36  ;;  %v582_v20 = vmul.f32 0.03125, %v45_v18 }
  0x77   :  { %v63_v21 = vpop.xlane.xlu1 %62  ;;  %v596_v34 = vmul.f32 0.03125, %v37_v19 }
  0x78   :  { %v82_v22 = vmul.f32 %v582_v20, %v582_v20  ;;  %v76_v24 = vmul.f32 0.03125, %v63_v21  ;;  %v94_v15 = vsub.f32 %v519_v0, %v582_v20 }
  0x79   :  { %v78_v40 = vmul.f32 %v596_v34, %v596_v34 }
  0x7a   :  { %v88_v25 = vsub.f32 %v76_v24, %v82_v22 }
  0x7c   :  { %v100_v27 = vadd.f32 1e-05, %v88_v25 }
  0x7d   :  { %v47_v28 = vpop.xlane.xlu0 %46 }
  0x7e   :  { %v39_v29 = vpop.xlane.xlu2 %38  ;;  %v592_v30 = vmul.f32 0.03125, %v47_v28  ;;  %462 = vrsqrt.f32 %v100_v27  ;;  %vm148_vm1 = vweird.f32 %v100_v27 }
  0x7f   :  { %v65_v31 = vpop.xlane.xlu1 %64  ;;  %v600_v46 = vmul.f32 0.03125, %v39_v29  ;;  %v460_v29 = vld [vmem:[%s670_s4] ss:$0 sm:$0xff] }
  0x80   :  { %v83_v32 = vmul.f32 %v592_v30, %v592_v30  ;;  %v77_v33 = vmul.f32 0.03125, %v65_v31  ;;  %v95_v0 = vsub.f32 %v533_v3, %v592_v30 }
  0x81   :  { %v79_v53 = vmul.f32 %v600_v46, %v600_v46 }
  0x82   :  { %v89_v35 = vsub.f32 %v77_v33, %v83_v32 }
  0x84   :  { %v463_v36 = vpop.eup %462  ;;  %v101_v37 = vadd.f32 1e-05, %v89_v35 }
  0x85   :  { %v41_v38 = vpop.xlane.xlu0 %40  ;;  %v143_v41 = vmul.f32 %v463_v36, %v100_v27  ;;  %vm149_vm0 = vweird.f32 %v463_v36 }
  0x86   :  { %v55_v39 = vpop.xlane.xlu2 %54  ;;  %464 = vrsqrt.f32 %v101_v37  ;;  %v606_v51 = vmul.f32 0.03125, %v41_v38  ;;  %vm615_vm2 = vmor %vm148_vm1, %vm149_vm0  ;;  %vm158_vm4 = vweird.f32 %v101_v37 }
  0x87   :  { %v72_v42 = vmul.f32 0.03125, %v55_v39  ;;  %v43_v43 = vpop.xlane.xlu1 %42  ;;  %v144_v44 = vmul.f32 %v463_v36, %v143_v41 }
  0x88   :  { %v604_v49 = vmul.f32 0.03125, %v43_v43  ;;  %v80_v63 = vmul.f32 %v606_v51, %v606_v51 }
  0x89   :  { %v84_v45 = vsub.f32 %v72_v42, %v78_v40  ;;  %v145_v47 = vmul.f32 0.5, %v144_v44 }
  0x8a   :  { %v81_v59 = vmul.f32 %v604_v49, %v604_v49 }
  0x8b   :  { %v602_v48 = vadd.f32 1e-05, %v84_v45  ;;  %v146_v50 = vsub.f32 1.5, %v145_v47  ;;  %v90_v47 = vsub.f32 %v524_v1, %v596_v34  ;;  %v93_v1 = vsub.f32 %v554_v8, %v604_v49 }
  0x8c   :  { %v465_v52 = vpop.eup %464 }
  0x8d   :  { %466 = vrsqrt.f32 %v602_v48  ;;  %v57_v54 = vpop.xlane.xlu0 %56  ;;  %v147_v56 = vmul.f32 %v463_v36, %v146_v50  ;;  %v153_v57 = vmul.f32 %v465_v52, %v101_v37  ;;  %vm159_vm3 = vweird.f32 %v465_v52 }
  0x8e   :  { %v61_v55 = vpop.xlane.xlu2 %60  ;;  %v73_v58 = vmul.f32 0.03125, %v57_v54  ;;  %vm160_vm5 = vmor %vm158_vm4, %vm159_vm3  ;;  %vm108_vm7 = vweird.f32 %v602_v48 }
  0x8f   :  { %v75_v60 = vmul.f32 0.03125, %v61_v55  ;;  %v59_v61 = vpop.xlane.xlu1 %58  ;;  %v154_v62 = vmul.f32 %v465_v52, %v153_v57  ;;  %v151_v14 = vsel %vm615_vm2, %v463_v36, %v147_v56  ;;  %v91_v57 = vsub.f32 %v538_v4, %v600_v46 }
  0x90   :  { %v85_v2 = vsub.f32 %v73_v58, %v79_v53  ;;  %v74_v5 = vmul.f32 0.03125, %v59_v61  ;;  %v166_v22 = vmul.f32 %v151_v14, %v94_v15 }
  0x91   :  { %v87_v9 = vsub.f32 %v75_v60, %v81_v59  ;;  %v155_v11 = vmul.f32 0.5, %v154_v62  ;;  %v92_v60 = vsub.f32 %v549_v7, %v606_v51  ;;  %v461_v51 = vld [vmem:[%s671_s2] ss:$0 sm:$0xff] }
  0x92   :  { %v97_v12 = vadd.f32 1e-05, %v85_v2  ;;  %v86_v13 = vsub.f32 %v74_v5, %v80_v63  ;;  %v176_v28 = vmul.f32 %v627_v23, %v166_v22 }
  0x93   :  { %v467_v10 = vpop.eup %466  ;;  %v99_v17 = vadd.f32 1e-05, %v87_v9  ;;  %v156_v18 = vsub.f32 1.5, %v155_v11 }
  0x94   :  { %v103_v16 = vmul.f32 %v467_v10, %v602_v48  ;;  %468 = vrsqrt.f32 %v97_v12  ;;  %v98_v19 = vadd.f32 1e-05, %v86_v13  ;;  %vm109_vm6 = vweird.f32 %v467_v10 }
  0x95   :  { %470 = vrsqrt.f32 %v99_v17  ;;  %v157_v24 = vmul.f32 %v465_v52, %v156_v18  ;;  %v186_v39 = vadd.f32 %v460_v29, %v176_v28  ;;  %vm110_vm8 = vmor %vm108_vm7, %vm109_vm6  ;;  %vm118_vm11 = vweird.f32 %v97_v12 }
  0x96   :  { %v104_v21 = vmul.f32 %v467_v10, %v103_v16  ;;  %472 = vrsqrt.f32 %v98_v19  ;;  %vm138_vm14 = vweird.f32 %v99_v17  ;;  %vm128_vm0 = vweird.f32 %v98_v19 }
  0x97   :  { %v161_v25 = vsel %vm160_vm5, %v465_v52, %v157_v24 }
  0x98   :  { %v105_v20 = vmul.f32 0.5, %v104_v21  ;;  %v167_v27 = vmul.f32 %v161_v25, %v95_v0 }
  0x9a   :  { %v106_v26 = vsub.f32 1.5, %v105_v20  ;;  %v469_v31 = vpop.eup %468  ;;  %v177_v36 = vmul.f32 %v627_v23, %v167_v27 }
  0x9b   :  { %v471_v32 = vpop.eup %470  ;;  %v113_v35 = vmul.f32 %v469_v31, %v97_v12  ;;  %vm119_vm9 = vweird.f32 %v469_v31 }
  0x9c   :  { %v107_v33 = vmul.f32 %v467_v10, %v106_v26  ;;  %v473_v37 = vpop.eup %472  ;;  %v133_v3 = vmul.f32 %v471_v32, %v99_v17  ;;  %v187_v40 = vadd.f32 %v460_v29, %v177_v36  ;;  %vm139_vm10 = vweird.f32 %v471_v32  ;;  %vm120_vm13 = vmor %vm118_vm11, %vm119_vm9 }
  0x9d   :  { %v114_v30 = vmul.f32 %v469_v31, %v113_v35  ;;  %v123_v38 = vmul.f32 %v473_v37, %v98_v19  ;;  %vm129_vm12 = vweird.f32 %v473_v37  ;;  %vm140_vm15 = vmor %vm138_vm14, %vm139_vm10 }
  0x9e   :  { %v134_v41 = vmul.f32 %v471_v32, %v133_v3  ;;  %v190_v44 = vpack.c.bf16 %v187_v40, %v186_v39  ;;  %v111_v45 = vsel %vm110_vm8, %v467_v10, %v107_v33  ;;  %vm130_vm1 = vmor %vm128_vm0, %vm129_vm12 }
  0x9f   :  { %v115_v42 = vmul.f32 0.5, %v114_v30  ;;  %v124_v43 = vmul.f32 %v473_v37, %v123_v38  ;;  %v162_v54 = vmul.f32 %v111_v45, %v90_v47 }
  0xa0   :  { %v135_v50 = vmul.f32 0.5, %v134_v41  ;;  %279 = vmatmul.bf16.vlgmr.msra.gmra.mxu2 %v190_v44 }
  0xa1   :  { %v116_v52 = vsub.f32 1.5, %v115_v42  ;;  %v125_v53 = vmul.f32 0.5, %v124_v43  ;;  %v172_v62 = vmul.f32 %v627_v23, %v162_v54 }
  0xa2   :  { %v136_v48 = vsub.f32 1.5, %v135_v50 }
  0xa3   :  { %v117_v55 = vmul.f32 %v469_v31, %v116_v52  ;;  %v126_v56 = vsub.f32 1.5, %v125_v53  ;;  %v182_v8 = vadd.f32 %v460_v29, %v172_v62 }
  0xa4   :  { %v137_v58 = vmul.f32 %v471_v32, %v136_v48 }
  0xa5   :  { %v127_v34 = vmul.f32 %v473_v37, %v126_v56  ;;  %v121_v59 = vsel %vm120_vm13, %v469_v31, %v117_v55 }
  0xa6   :  { %v163_v61 = vmul.f32 %v121_v59, %v91_v57  ;;  %v141_v63 = vsel %vm140_vm15, %v471_v32, %v137_v58 }
  0xa7   :  { %v131_v2 = vsel %vm130_vm1, %v473_v37, %v127_v34  ;;  %v165_v4 = vmul.f32 %v141_v63, %v93_v1 }
  0xa8   :  { %v173_v46 = vmul.f32 %v627_v23, %v163_v61  ;;  %v164_v5 = vmul.f32 %v131_v2, %v92_v60 }
  0xa9   :  { %v175_v6 = vmul.f32 %v627_v23, %v165_v4 }
  0xaa   :  { %v183_v49 = vadd.f32 %v460_v29, %v173_v46  ;;  %v174_v9 = vmul.f32 %v627_v23, %v164_v5 }
  0xab   :  { %v185_v12 = vadd.f32 %v460_v29, %v175_v6 }
  0xac   :  { %v188_v10 = vpack.c.bf16 %v183_v49, %v182_v8  ;;  %v184_v11 = vadd.f32 %v460_v29, %v174_v9 }
  0xae   :  { %269 = vmatmul.bf16.vlgmr.msra.gmra.mxu0 %v188_v10  ;;  %v189_v7 = vpack.c.bf16 %v185_v12, %v184_v11 }
  0xb0   :  { %274 = vmatmul.bf16.vlgmr.msra.gmra.mxu1 %v189_v7 }
 0x123   :  { %v280_v13 = vpop.f32.mrf.mxu2 }
 0x124   :  { %v314_v14 = vadd.f32 %v461_v51, %v280_v13 }
 0x126   :  { %v320_v15 = vmul.f32 %v314_v14, %v314_v14 }
 0x128   :  { %v326_v16 = vmul.f32 %v320_v15, %v314_v14 }
 0x12a   :  { %v332_v17 = vmul.f32 0.044715, %v326_v16 }
 0x12b   :  { %v270_v18 = vpop.f32.mrf.mxu0  ;;  %v282_v21 = vpop.f32.mrf.mxu2 }
 0x12c   :  { %v652_v19 = vadd.f32 %v461_v51, %v270_v18  ;;  %v338_v22 = vadd.f32 %v332_v17, %v314_v14  ;;  %v315_v23 = vadd.f32 %v461_v51, %v282_v21 }
 0x12d   :  { %v275_v24 = vpop.f32.mrf.mxu1 }
 0x12e   :  { %v316_v0 = vmul.f32 %v652_v19, %v652_v19  ;;  %v312_v20 = vadd.f32 %v461_v51, %v275_v24  ;;  %v344_v25 = vmul.f32 0.7978846, %v338_v22  ;;  %v321_v26 = vmul.f32 %v315_v23, %v315_v23 }
 0x130   :  { %v322_v27 = vmul.f32 %v316_v0, %v652_v19  ;;  %v318_v28 = vmul.f32 %v312_v20, %v312_v20  ;;  %v327_v29 = vmul.f32 %v321_v26, %v315_v23  ;;  %474 = vtanh.f32 %v344_v25 }
 0x132   :  { %v328_v31 = vmul.f32 0.044715, %v322_v27  ;;  %v324_v32 = vmul.f32 %v318_v28, %v312_v20  ;;  %v333_v33 = vmul.f32 0.044715, %v327_v29 }
 0x133   :  { %v272_v35 = vpop.f32.mrf.mxu0 }
 0x134   :  { %v334_v36 = vadd.f32 %v328_v31, %v652_v19  ;;  %v330_v37 = vmul.f32 0.044715, %v324_v32  ;;  %v311_v3 = vadd.f32 %v461_v51, %v272_v35  ;;  %v339_v30 = vadd.f32 %v333_v33, %v315_v23 }
 0x135   :  { %v277_v38 = vpop.f32.mrf.mxu1 }
 0x136   :  { %v340_v39 = vmul.f32 0.7978846, %v334_v36  ;;  %v336_v40 = vadd.f32 %v330_v37, %v312_v20  ;;  %v317_v41 = vmul.f32 %v311_v3, %v311_v3  ;;  %v313_v42 = vadd.f32 %v461_v51, %v277_v38  ;;  %v475_v45 = vpop.eup %474 }
 0x137   :  { %v345_v43 = vmul.f32 0.7978846, %v339_v30  ;;  %v356_v48 = vadd.f32 1.0, %v475_v45 }
 0x138   :  { %v323_v44 = vmul.f32 %v317_v41, %v311_v3  ;;  %v342_v47 = vmul.f32 0.7978846, %v336_v40  ;;  %v319_v50 = vmul.f32 %v313_v42, %v313_v42 }
 0x139   :  { %476 = vtanh.f32 %v345_v43  ;;  %v362_v34 = vmul.f32 0.5, %v356_v48 }
 0x13a   :  { %478 = vtanh.f32 %v340_v39  ;;  %v329_v52 = vmul.f32 0.044715, %v323_v44  ;;  %v325_v53 = vmul.f32 %v319_v50, %v313_v42 }
 0x13b   :  { %480 = vtanh.f32 %v342_v47  ;;  %v368_v2 = vmul.f32 %v362_v34, %v314_v14 }
 0x13c   :  { %v335_v54 = vadd.f32 %v329_v52, %v311_v3  ;;  %v331_v55 = vmul.f32 0.044715, %v325_v53 }
 0x13e   :  { %v341_v56 = vmul.f32 0.7978846, %v335_v54  ;;  %v337_v58 = vadd.f32 %v331_v55, %v313_v42 }
 0x13f   :  { %v477_v57 = vpop.eup %476 }
 0x140   :  { %v479_v1 = vpop.eup %478  ;;  %v357_v59 = vadd.f32 1.0, %v477_v57  ;;  %482 = vtanh.f32 %v341_v56  ;;  %v343_v60 = vmul.f32 0.7978846, %v337_v58 }
 0x141   :  { %v481_v62 = vpop.eup %480  ;;  %v352_v63 = vadd.f32 1.0, %v479_v1 }
 0x142   :  { %v363_v61 = vmul.f32 0.5, %v357_v59  ;;  %484 = vtanh.f32 %v343_v60  ;;  %v354_v6 = vadd.f32 1.0, %v481_v62 }
 0x143   :  { %v358_v8 = vmul.f32 0.5, %v352_v63 }
 0x144   :  { %v369_v4 = vmul.f32 %v363_v61, %v315_v23  ;;  %v360_v11 = vmul.f32 0.5, %v354_v6 }
 0x145   :  { %v364_v7 = vmul.f32 %v358_v8, %v652_v19 }
 0x146   :  { %v483_v46 = vpop.eup %482  ;;  %v439_v5 = vpack.c.bf16 %v369_v4, %v368_v2  ;;  %v366_v14 = vmul.f32 %v360_v11, %v312_v20 }
 0x147   :  { %v353_v49 = vadd.f32 1.0, %v483_v46 }
 0x148   :  { %442 = vst [vmem:[%s673_s5 + $0x10] sm:$0xff] %v439_v5   ;;  %v485_v9 = vpop.eup %484 }
 0x149   :  { %v359_v10 = vmul.f32 0.5, %v353_v49  ;;  %v355_v12 = vadd.f32 1.0, %v485_v9 }
 0x14b   :  { %v365_v51 = vmul.f32 %v359_v10, %v311_v3  ;;  %v361_v13 = vmul.f32 0.5, %v355_v12 }
 0x14d   :  { %v429_v15 = vpack.c.bf16 %v365_v51, %v364_v7  ;;  %v367_v16 = vmul.f32 %v361_v13, %v313_v42 }
 0x14f   :  { %430 = vst [vmem:[%s673_s5] sm:$0xff] %v429_v15   ;;  %v434_v17 = vpack.c.bf16 %v367_v16, %v366_v14 }
 0x151   :  { %441 = vst [vmem:[%s673_s5 + $0x8] sm:$0xff] %v434_v17  }

</bundles_post_ra>
